<compile_context>
chip_gen: v7x
topology: tpu7x:2x2x1
jax: 0.10.0
libtpu: 0.0.40
codegen_flags: <defaults>
</compile_context>

<pallas_src>
import functools

import jax
import jax.numpy as jnp
from jax.experimental import pallas as pl
from jax.experimental.pallas import tpu as pltpu


def _round_up(x, m):
    return (x + m - 1) // m * m


# --------------------------- host-side weight prep ------------------------ #
def _phase_weight(w_t):
    """Fold ConvTranspose2d(3x3, stride=2, pad=1, out_pad=1) taps into a
    (4*C_in, 4*C_out) matrix.

    Rows = 4 shifted input views [x(i,j), x(i,j+1), x(i+1,j), x(i+1,j+1)].
    Cols = 4 output sub-pixel phases [(2i,2j), (2i,2j+1), (2i+1,2j), (2i+1,2j+1)].
    w_t  = ConvTranspose2d weight, shape (C_in, C_out, 3, 3).
    """
    c_in, c_out = w_t.shape[0], w_t.shape[1]
    z = jnp.zeros((c_in, c_out), w_t.dtype)
    t = lambda kh, kw: w_t[:, :, kh, kw]
    return jnp.block([
        [t(1, 1), t(1, 2), t(2, 1), t(2, 2)],
        [z,       t(1, 0), z,       t(2, 0)],
        [z,       z,       t(0, 1), t(0, 2)],
        [z,       z,       z,       t(0, 0)],
    ])


def _shifted_views(x_nchw):
    """(N, C, H, W) -> channels-last (N, H*W, 4*C): the 4 dense shifted views
    needed by the sub-pixel decomposition (replaces a 9x zero-dilated im2col)."""
    n, c, h, w = x_nchw.shape
    xl = jnp.transpose(x_nchw, (0, 2, 3, 1))               # NHWC
    xp = jnp.pad(xl, ((0, 0), (0, 1), (0, 1), (0, 0)))     # zero pad bottom/right
    views = [xp[:, :h, :w, :], xp[:, :h, 1:, :],
             xp[:, 1:, :w, :], xp[:, 1:, 1:, :]]
    return jnp.concatenate(views, axis=-1).reshape(n, h * w, 4 * c)


# ----------------------------- block-size planning ------------------------- #
def _vmem_estimate(g, p, k, c4):
    # bf16 input/weight/output blocks (double-buffered) + f32 epilogue temps.
    blocks = g * p * k * 2 + k * c4 * 2 + g * p * c4 * 2
    temps = 6 * g * p * c4 * 4
    return 2 * blocks + temps


def _pick_batch_group(n, p, k, c4, budget=40 << 20):
    """Largest useful batch-group g (divides N) so the MXU M dim is filled."""
    if p % 8 != 0:          # in-kernel (g,P,·)<->(g*P,·) reshapes need P % 8 == 0
        return 1
    divisors = [d for d in range(1, n + 1) if n % d == 0]
    fitting = [g for g in divisors if _vmem_estimate(g, p, k, c4) <= budget]
    if not fitting:
        return 1
    preferred = [g for g in fitting if g * p >= 256]    # fill 256-row MXU
    return preferred[0] if preferred else fitting[-1]


# ------------------------------ Pallas kernel ----------------------------- #
def _uk_kernel(x_ref, w_ref, o_ref, *, g, p, c_out, inv_count):
    # x_ref: (g, P, K)      bf16 shifted-view patches (g samples per block)
    # w_ref: (K, 4*C_out)   bf16 phase weights (grid-invariant)
    # o_ref: (g, P, 4*C_out) bf16 output (phases packed on lanes)
    k = x_ref.shape[-1]
    c4 = 4 * c_out

    # Single MXU pass: (g*P, K) x (K, 4*C_out), bf16 operands, f32 accumulation.
    xm = x_ref[...].reshape(g * p, k)
    y = jnp.dot(xm, w_ref[...], preferred_element_type=jnp.float32)
    y = y.reshape(g, p, c4)

    # InstanceNorm2d (affine=False, eps=1e-5, biased variance): per-sample,
    # per-channel stats over the (2H)*(2W) = 4*P output positions.  Channel c
    # occupies lanes {c, C+c, 2C+c, 3C+c} (one per sub-pixel phase), so the
    # four phase blocks of the column sums are combined.  Two-pass form keeps
    # the numerics clean; everything stays f32.
    s = jnp.sum(y, axis=1, keepdims=True)                       # (g, 1, 4C)
    s_c = (s[..., 0:c_out] + s[..., c_out:2 * c_out]
           + s[..., 2 * c_out:3 * c_out] + s[..., 3 * c_out:4 * c_out])
    mean = s_c * inv_count                                      # (g, 1, C)
    mean4 = jnp.concatenate([mean, mean, mean, mean], axis=-1)  # (g, 1, 4C)
    d = y - mean4
    v = jnp.sum(d * d, axis=1, keepdims=True)                   # (g, 1, 4C)
    v_c = (v[..., 0:c_out] + v[..., c_out:2 * c_out]
           + v[..., 2 * c_out:3 * c_out] + v[..., 3 * c_out:4 * c_out])
    inv = jax.lax.rsqrt(v_c * inv_count + 1e-5)                 # (g, 1, C)
    inv4 = jnp.concatenate([inv, inv, inv, inv], axis=-1)
    o_ref[...] = jnp.maximum(d * inv4, 0.0).astype(o_ref.dtype)  # ReLU, bf16 store


# ------------------------------ forward wrapper ---------------------------- #
def u_k_block_forward(x_nchw, w_t, b=None):
    """U_K_Block forward: (N, C_in, H, W) f32 -> (N, C_out, 2H, 2W) f32.

    The ConvTranspose2d bias `b` is intentionally ignored: InstanceNorm2d
    (affine=False) subtracts the per-channel mean, which cancels any
    per-channel constant bias exactly, so it is dead compute.
    """
    del b
    n, c_in, h, w = x_nchw.shape
    c_out = w_t.shape[1]

    # Pad channels so K = 4*C_in and 4*C_out are multiples of 128 (lane-dense
    # MXU operands, unmasked stores).  Zero channels are exact no-ops.
    c_in_p = _round_up(c_in, 32)
    c_out_p = _round_up(c_out, 32)
    if c_in_p != c_in:
        x_nchw = jnp.pad(x_nchw, ((0, 0), (0, c_in_p - c_in), (0, 0), (0, 0)))
    w_p = jnp.pad(w_t, ((0, c_in_p - c_in), (0, c_out_p - c_out), (0, 0), (0, 0)))

    p = h * w
    k = 4 * c_in_p
    c4 = 4 * c_out_p

    # TODO(synk): drop the 4x-duplicated patches array by DMA-ing the padded
    # NHWC slab once and building the 4 shifted views inside the kernel.
    patches = _shifted_views(x_nchw.astype(jnp.bfloat16))        # (N, P, K) bf16
    w_big = _phase_weight(w_p.astype(jnp.float32)).astype(jnp.bfloat16)  # (K, 4C)

    g = _pick_batch_group(n, p, k, c4)
    est = _vmem_estimate(g, p, k, c4)
    if est > (48 << 20):
        # TODO(synk): tile the spatial axis with partial-sum InstanceNorm stats
        # (two-pass) so very large decoder feature maps fit v7x's 64 MiB VMEM.
        raise ValueError(
            f"U_K_Block Pallas kernel: resident block set (~{est >> 20} MiB) "
            "exceeds the VMEM budget; spatially-tiled stats not implemented.")
    vmem_limit = int(min(64 << 20, max(est + (4 << 20), 32 << 20)))

    kern = functools.partial(_uk_kernel, g=g, p=p, c_out=c_out_p,
                             inv_count=1.0 / (4 * p))
    out = pl.pallas_call(
        kern,
        out_shape=jax.ShapeDtypeStruct((n, p, c4), jnp.bfloat16),
        grid_spec=pltpu.PrefetchScalarGridSpec(
            num_scalar_prefetch=0,
            grid=(n // g,),                          # batch groups (parallel)
            in_specs=[
                pl.BlockSpec((g, p, k), lambda i: (i, 0, 0)),
                pl.BlockSpec((k, c4), lambda i: (0, 0)),   # invariant weight block
            ],
            out_specs=pl.BlockSpec((g, p, c4), lambda i: (i, 0, 0)),
        ),
        compiler_params=pltpu.CompilerParams(
            dimension_semantics=("parallel",),
            vmem_limit_bytes=vmem_limit),
    )(patches, w_big)

    # Sub-pixel phases -> spatial interleave (depth-to-space), drop channel
    # padding, convert to NCHW f32.  XLA fuses this into one transposing pass.
    y = out.reshape(n, h, w, 2, 2, c_out_p)
    y = jnp.transpose(y, (0, 1, 3, 2, 4, 5)).reshape(n, 2 * h, 2 * w, c_out_p)
    y = jnp.transpose(y, (0, 3, 1, 2))[:, :c_out]
    return y.astype(jnp.float32)


# ----------------------------- pure-JAX reference -------------------------- #
def _ref_forward(x, w_t, b):
    # ConvTranspose2d == conv with lhs_dilation=2, flipped/transposed weight,
    # padding low = k-1-p = 1, high = k-1-p+output_padding = 2.
    w_r = jnp.flip(jnp.transpose(w_t, (1, 0, 2, 3)), axis=(2, 3))  # (C_out,C_in,3,3)
    y = jax.lax.conv_general_dilated(
        x, w_r, window_strides=(1, 1), padding=((1, 2), (1, 2)),
        lhs_dilation=(2, 2), dimension_numbers=("NCHW", "OIHW", "NCHW"))
    y = y + b[None, :, None, None]
    m = y.mean(axis=(2, 3), keepdims=True)
    v = ((y - m) ** 2).mean(axis=(2, 3), keepdims=True)
    y = (y - m) * jax.lax.rsqrt(v + 1e-5)
    return jnp.maximum(y, 0.0)


if __name__ == "__main__":
    key = jax.random.PRNGKey(0)
    k_w, k_b, k_x = jax.random.split(key, 3)

    # Small but kernel-friendly shapes: N=2, C_in=64, C_out=128, H=W=8.
    # (K = 4*C_in = 256 -> one full-depth MXU pass; 4*C_out = 512 keeps the
    #  output lane-dense; batch grouping g=2 gives MXU M = 128.)
    N, C_IN, C_OUT, H, W = 2, 64, 128, 8, 8
    bound = 1.0 / jnp.sqrt(jnp.float32(C_IN * 9))
    w_t = jax.random.uniform(k_w, (C_IN, C_OUT, 3, 3), jnp.float32, -bound, bound)
    b = jax.random.uniform(k_b, (C_OUT,), jnp.float32, -bound, bound)
    x = jax.random.normal(k_x, (N, C_IN, H, W), jnp.float32)

    out = jax.block_until_ready(u_k_block_forward(x, w_t, b))
    assert out.shape == (N, C_OUT, 2 * H, 2 * W), out.shape

    ref = jax.block_until_ready(_ref_forward(x, w_t, b))
    err = float(jnp.max(jnp.abs(out - ref)))
    # Tolerance covers bf16 MXU operands and the bf16 kernel output (reference
    # is full f32); the dropped bias is exactly cancelled by InstanceNorm.
    assert jnp.allclose(out, ref, atol=5e-2, rtol=5e-2), err

    print("KERNEL_OK")
</pallas_src>

<mosaic_0001>
module attributes {stable_mosaic.version = 11 : i64} {
  func.func @_uk_kernel(%arg0: i32, %arg1: memref<2x64x256xbf16, #tpu.memory_space<vmem>>, %arg2: memref<256x512xbf16, #tpu.memory_space<vmem>>, %arg3: memref<2x64x512xbf16, #tpu.memory_space<vmem>>) attributes {dimension_semantics = [#tpu.dimension_semantics<parallel>], iteration_bounds = array<i64: 1>, scalar_prefetch = 0 : i64, scratch_operands = 0 : i64, tpu.core_type = #tpu.core_type<tc>, window_params = [{transform_indices = @transform_0, window_bounds = array<i64: 2, 64, 256>}, {pipeline_mode = #tpu.pipeline_mode<synchronous>, transform_indices = @transform_1, window_bounds = array<i64: 256, 512>}, {transform_indices = @transform_2, window_bounds = array<i64: 2, 64, 512>}]} {
    %c0 = arith.constant 0 : index
    %c0_0 = arith.constant 0 : index
    %c0_1 = arith.constant 0 : index
    %0 = vector.load %arg1[%c0, %c0_0, %c0_1] : memref<2x64x256xbf16, #tpu.memory_space<vmem>>, vector<2x64x256xbf16>
    %1 = vector.shape_cast %0 : vector<2x64x256xbf16> to vector<128x256xbf16>
    %c0_2 = arith.constant 0 : index
    %c0_3 = arith.constant 0 : index
    %2 = vector.load %arg2[%c0_2, %c0_3] : memref<256x512xbf16, #tpu.memory_space<vmem>>, vector<256x512xbf16>
    %cst = arith.constant dense<0.000000e+00> : vector<128x512xf32>
    %3 = tpu.matmul %1, %2, %cst {dimension_numbers = #tpu.dot_dimension_numbers<[1], [0], [0], [1], [0, 0, 1, 1], [], []>} : vector<128x256xbf16>, vector<256x512xbf16>, vector<128x512xf32> -> vector<128x512xf32>
    %4 = vector.shape_cast %3 : vector<128x512xf32> to vector<2x64x512xf32>
    %cst_4 = arith.constant dense<0.000000e+00> : vector<2x512xf32>
    %5 = vector.multi_reduction <add>, %4, %cst_4 [1] : vector<2x64x512xf32> to vector<2x512xf32>
    %6 = vector.shape_cast %5 : vector<2x512xf32> to vector<2x1x512xf32>
    %7 = vector.extract_strided_slice %6 {offsets = [0, 0, 0], sizes = [2, 1, 128], strides = [1, 1, 1]} : vector<2x1x512xf32> to vector<2x1x128xf32>
    %8 = vector.extract_strided_slice %6 {offsets = [0, 0, 128], sizes = [2, 1, 128], strides = [1, 1, 1]} : vector<2x1x512xf32> to vector<2x1x128xf32>
    %9 = arith.addf %7, %8 : vector<2x1x128xf32>
    %10 = vector.extract_strided_slice %6 {offsets = [0, 0, 256], sizes = [2, 1, 128], strides = [1, 1, 1]} : vector<2x1x512xf32> to vector<2x1x128xf32>
    %11 = arith.addf %9, %10 : vector<2x1x128xf32>
    %12 = vector.extract_strided_slice %6 {offsets = [0, 0, 384], sizes = [2, 1, 128], strides = [1, 1, 1]} : vector<2x1x512xf32> to vector<2x1x128xf32>
    %13 = arith.addf %11, %12 : vector<2x1x128xf32>
    %cst_5 = arith.constant 3.906250e-03 : f32
    %14 = vector.broadcast %cst_5 : f32 to vector<2x1x128xf32>
    %15 = arith.mulf %13, %14 : vector<2x1x128xf32>
    %16 = tpu.concatenate %15, %15, %15, %15 in 2 : vector<2x1x128xf32>, vector<2x1x128xf32>, vector<2x1x128xf32>, vector<2x1x128xf32> -> vector<2x1x512xf32>
    %17 = vector.broadcast %16 : vector<2x1x512xf32> to vector<2x64x512xf32>
    %18 = arith.subf %4, %17 : vector<2x64x512xf32>
    %19 = arith.mulf %18, %18 : vector<2x64x512xf32>
    %cst_6 = arith.constant dense<0.000000e+00> : vector<2x512xf32>
    %20 = vector.multi_reduction <add>, %19, %cst_6 [1] : vector<2x64x512xf32> to vector<2x512xf32>
    %21 = vector.shape_cast %20 : vector<2x512xf32> to vector<2x1x512xf32>
    %22 = vector.extract_strided_slice %21 {offsets = [0, 0, 0], sizes = [2, 1, 128], strides = [1, 1, 1]} : vector<2x1x512xf32> to vector<2x1x128xf32>
    %23 = vector.extract_strided_slice %21 {offsets = [0, 0, 128], sizes = [2, 1, 128], strides = [1, 1, 1]} : vector<2x1x512xf32> to vector<2x1x128xf32>
    %24 = arith.addf %22, %23 : vector<2x1x128xf32>
    %25 = vector.extract_strided_slice %21 {offsets = [0, 0, 256], sizes = [2, 1, 128], strides = [1, 1, 1]} : vector<2x1x512xf32> to vector<2x1x128xf32>
    %26 = arith.addf %24, %25 : vector<2x1x128xf32>
    %27 = vector.extract_strided_slice %21 {offsets = [0, 0, 384], sizes = [2, 1, 128], strides = [1, 1, 1]} : vector<2x1x512xf32> to vector<2x1x128xf32>
    %28 = arith.addf %26, %27 : vector<2x1x128xf32>
    %cst_7 = arith.constant 3.906250e-03 : f32
    %29 = vector.broadcast %cst_7 : f32 to vector<2x1x128xf32>
    %30 = arith.mulf %28, %29 : vector<2x1x128xf32>
    %cst_8 = arith.constant 9.99999974E-6 : f32
    %31 = vector.broadcast %cst_8 : f32 to vector<2x1x128xf32>
    %32 = arith.addf %30, %31 : vector<2x1x128xf32>
    %33 = math.rsqrt %32 : vector<2x1x128xf32>
    %34 = tpu.concatenate %33, %33, %33, %33 in 2 : vector<2x1x128xf32>, vector<2x1x128xf32>, vector<2x1x128xf32>, vector<2x1x128xf32> -> vector<2x1x512xf32>
    %35 = vector.broadcast %34 : vector<2x1x512xf32> to vector<2x64x512xf32>
    %36 = arith.mulf %18, %35 : vector<2x64x512xf32>
    %cst_9 = arith.constant 0.000000e+00 : f32
    %37 = vector.broadcast %cst_9 : f32 to vector<2x64x512xf32>
    %38 = arith.maximumf %36, %37 : vector<2x64x512xf32>
    %39 = arith.truncf %38 : vector<2x64x512xf32> to vector<2x64x512xbf16>
    %c0_10 = arith.constant 0 : index
    %c0_11 = arith.constant 0 : index
    %c0_12 = arith.constant 0 : index
    %40 = vector.load %arg3[%c0_10, %c0_11, %c0_12] : memref<2x64x512xbf16, #tpu.memory_space<vmem>>, vector<2x64x512xbf16>
    tpu.vector_store %arg3[%c0_10, %c0_11, %c0_12], %39 {strides = array<i32>} : memref<2x64x512xbf16, #tpu.memory_space<vmem>>, vector<2x64x512xbf16>,
    return
  }
  func.func @transform_0(%arg0: i32) -> (i32, i32, i32) {
    %c0_i32 = arith.constant 0 : i32
    %c0_i32_0 = arith.constant 0 : i32
    %c0_i32_1 = arith.constant 0 : i32
    return %arg0, %c0_i32, %c0_i32_0 : i32, i32, i32
  }
  func.func @transform_1(%arg0: i32) -> (i32, i32) {
    %c0_i32 = arith.constant 0 : i32
    %c0_i32_0 = arith.constant 0 : i32
    %c0_i32_1 = arith.constant 0 : i32
    return %c0_i32, %c0_i32_0 : i32, i32
  }
  func.func @transform_2(%arg0: i32) -> (i32, i32, i32) {
    %c0_i32 = arith.constant 0 : i32
    %c0_i32_0 = arith.constant 0 : i32
    %c0_i32_1 = arith.constant 0 : i32
    return %arg0, %c0_i32, %c0_i32_0 : i32, i32, i32
  }
}

</mosaic_0001>

<bundles_post_ra>
// kernel: tpu_custom_call.1
= control target key start
LH: loop header
LB: loop body
LE: loop exit
PB: predicated region body
PF: predicated region fallthrough
CT: control target
= control target key end

     0   :  { %7 = vsyncpa [#allocation3], 0  ;;  %s2559_s0 = inlined_call_operand.hbm [shape: bf16[2,64,256], index: 0, kind: input, shape index: {}]   ;;  %s2560_s1 = inlined_call_operand.hbm [shape: bf16[256,512], index: 1, kind: input, shape index: {}]   ;;  %s2561_s2 = inlined_call_operand.hbm [shape: bf16[2,64,512], index: 2, kind: output, shape index: {}]  }
   0x1   :  { %8 = vsyncpa [#allocation6], 0 }
   0x2   :  { %9 = vsyncpa [#allocation4], 0  ;;  %s1835_s9 = smov [#allocation2]   ;;  %s1763_s13 = scalar_lea.hbm %s2559_s0, 2048 }
   0x3   :  { %s15_s10 = sshll.u32 %s1835_s9, 4  ;;  %p1764_p0 = scmp.ne.s32.totalorder %s2559_s0, %s1763_s13  ;;  %s16_s10 = int_to_ptr.vmem [resolvable:$true] %s15_s10 }
   0x4   :  { %p1767_p1 = scmp.lt.u32.totalorder %s1763_s13, %s2559_s0 }
   0x6   :  { %p1769_p2 = pnand %p1767_p1, %p1764_p0 }
   0x8   :  { %1772 = shalt.err (!%p1769_p2)
}
   0x9   :  { %s1773_s18 = scalar_lea.vmem %s16_s10, 2048  ;;  %p1778_p4 = scmp.lt.s32.totalorder %s16_s10, %s16_s10 }
   0xa   :  { %p1774_p3 = scmp.ne.s32.totalorder %s16_s10, %s1773_s18  ;;  %p1779_p5 = scmp.lt.s32.totalorder %s1773_s18, %s1773_s18 }
   0xc   :  { %p1780_p6 = por %p1779_p5, %p1778_p4 }
   0xe   :  { %p1781_p7 = pnand %p1780_p6, %p1774_p3 }
  0x10   :  { %1784 = shalt.err (!%p1781_p7)
}
  0x11   :  { %s1836_s19 = smov 128   ;;  %s1837_s20 = smov 8  }
  0x12   :  { %21 = dma.hbm_to_vmem [thread:$0]  %s2559_s0, 2048, %s16_s10, [#allocation3], %s1836_s19, %s1836_s19, %s1837_s20  }
  0x13   :  { %s1838_s23 = smov [#allocation5]   ;;  %s1785_s27 = scalar_lea.hbm %s2560_s1, 8192 }
  0x14   :  { %s27_s24 = sshll.u32 %s1838_s23, 4  ;;  %p1786_p8 = scmp.ne.s32.totalorder %s2560_s1, %s1785_s27  ;;  %s28_s24 = int_to_ptr.vmem [resolvable:$true] %s27_s24 }
  0x15   :  { %p1789_p9 = scmp.lt.u32.totalorder %s1785_s27, %s2560_s1 }
  0x17   :  { %p1791_p10 = pnand %p1789_p9, %p1786_p8 }
  0x19   :  { %1794 = shalt.err (!%p1791_p10)
}
  0x1a   :  { %s1795_s4 = scalar_lea.vmem %s28_s24, 8192  ;;  %p1800_p12 = scmp.lt.s32.totalorder %s28_s24, %s28_s24 }
  0x1b   :  { %p1796_p11 = scmp.ne.s32.totalorder %s28_s24, %s1795_s4  ;;  %p1801_p13 = scmp.lt.s32.totalorder %s1795_s4, %s1795_s4 }
  0x1d   :  { %p1802_p0 = por %p1801_p13, %p1800_p12 }
  0x1f   :  { %p1803_p1 = pnand %p1802_p0, %p1796_p11 }
  0x21   :  { %1806 = shalt.err (!%p1803_p1)
}
  0x22   :  { %s1839_s0 = smov 256   ;;  %s1840_s5 = smov 16  }
  0x23   :  { %33 = dma.hbm_to_vmem [thread:$0]  %s2560_s1, 8192, %s28_s24, [#allocation6], %s1839_s0, %s1839_s0, %s1840_s5  }
  0x24   :  { %1829 = dma.done.wait [#allocation3], 2048  }
  0x25   :  { %1830 = vsyncadd [#allocation3], 4294965248 }
  0x26   :  { %1831 = dma.done.wait [#allocation6], 8192  }
  0x27   :  { %1832 = vsyncadd [#allocation6], 4294959104  ;;  %v1639_v0 = vld [vmem:[#allocation5 + $0x4] ss:$16 sps:$4 sm:$0xff]   ;;  %v1641_v1 = vld [vmem:[#allocation5 + $0xc] ss:$16 sps:$4 sm:$0xff]  }
  0x28   :  { %520 = vmatprep.subr.bf16.mxu0 %v1639_v0  ;;  %v1643_v2 = vld [vmem:[#allocation5] ss:$16 sps:$4 sm:$0xff]   ;;  %v1644_v3 = vld [vmem:[#allocation5 + $0x8] ss:$16 sps:$4 sm:$0xff]   ;;  %633 = vmatprep.subr.bf16.mxu1 %v1641_v1  ;;  %v1645_v4 = vld [vmem:[#allocation5 + $0x24] ss:$16 sps:$4 sm:$0xff]  }
  0x29   :  { %521 = vmatpush1.bf16.msra.mxu0 %v1643_v2  ;;  %634 = vmatpush1.bf16.msra.mxu1 %v1644_v3  ;;  %v1647_v5 = vld [vmem:[#allocation5 + $0x2c] ss:$16 sps:$4 sm:$0xff]   ;;  %v1649_v6 = vld [vmem:[#allocation5 + $0x20] ss:$16 sps:$4 sm:$0xff]   ;;  %v1650_v7 = vld [vmem:[#allocation5 + $0x28] ss:$16 sps:$4 sm:$0xff]  }
  0x2a   :  { %522 = vmatprep.subr.bf16.mxu0 %v1645_v4  ;;  %635 = vmatprep.subr.bf16.mxu1 %v1647_v5  ;;  %v1651_v8 = vld [vmem:[#allocation5 + $0x44] ss:$16 sps:$4 sm:$0xff]   ;;  %v1653_v9 = vld [vmem:[#allocation5 + $0x4c] ss:$16 sps:$4 sm:$0xff]   ;;  %v1655_v10 = vld [vmem:[#allocation5 + $0x40] ss:$16 sps:$4 sm:$0xff]  }
  0x2b   :  { %v1656_v11 = vld [vmem:[#allocation5 + $0x48] ss:$16 sps:$4 sm:$0xff]   ;;  %v1657_v12 = vld [vmem:[#allocation5 + $0x64] ss:$16 sps:$4 sm:$0xff]   ;;  %v1659_v13 = vld [vmem:[#allocation5 + $0x6c] ss:$16 sps:$4 sm:$0xff]  }
  0x2c   :  { %v1661_v14 = vld [vmem:[#allocation5 + $0x60] ss:$16 sps:$4 sm:$0xff]   ;;  %v1662_v15 = vld [vmem:[#allocation5 + $0x68] ss:$16 sps:$4 sm:$0xff]   ;;  %v1663_v16 = vld [vmem:[#allocation5 + $0x84] ss:$16 sps:$4 sm:$0xff]  }
  0x2d   :  { %523 = vmatpush1.bf16.msra.mxu0 %v1649_v6  ;;  %636 = vmatpush1.bf16.msra.mxu1 %v1650_v7  ;;  %v1665_v17 = vld [vmem:[#allocation5 + $0x8c] ss:$16 sps:$4 sm:$0xff]   ;;  %v1667_v18 = vld [vmem:[#allocation5 + $0x80] ss:$16 sps:$4 sm:$0xff]   ;;  %v1668_v19 = vld [vmem:[#allocation5 + $0x88] ss:$16 sps:$4 sm:$0xff]  }
  0x2e   :  { %524 = vmatprep.subr.bf16.mxu0 %v1651_v8  ;;  %637 = vmatprep.subr.bf16.mxu1 %v1653_v9  ;;  %v1669_v20 = vld [vmem:[#allocation5 + $0xa4] ss:$16 sps:$4 sm:$0xff]   ;;  %v1671_v21 = vld [vmem:[#allocation5 + $0xac] ss:$16 sps:$4 sm:$0xff]   ;;  %v1673_v22 = vld [vmem:[#allocation5 + $0xa0] ss:$16 sps:$4 sm:$0xff]  }
  0x2f   :  { %v1674_v23 = vld [vmem:[#allocation5 + $0xa8] ss:$16 sps:$4 sm:$0xff]   ;;  %v1675_v24 = vld [vmem:[#allocation5 + $0xc4] ss:$16 sps:$4 sm:$0xff]   ;;  %v1677_v25 = vld [vmem:[#allocation5 + $0xcc] ss:$16 sps:$4 sm:$0xff]  }
  0x30   :  { %v1679_v26 = vld [vmem:[#allocation5 + $0xc0] ss:$16 sps:$4 sm:$0xff]   ;;  %v1680_v27 = vld [vmem:[#allocation5 + $0xc8] ss:$16 sps:$4 sm:$0xff]   ;;  %v1681_v28 = vld [vmem:[#allocation5 + $0xe4] ss:$16 sps:$4 sm:$0xff]  }
  0x31   :  { %525 = vmatpush1.bf16.msra.mxu0 %v1655_v10  ;;  %638 = vmatpush1.bf16.msra.mxu1 %v1656_v11  ;;  %v1683_v29 = vld [vmem:[#allocation5 + $0xec] ss:$16 sps:$4 sm:$0xff]   ;;  %v1685_v30 = vld [vmem:[#allocation5 + $0xe0] ss:$16 sps:$4 sm:$0xff]   ;;  %v1686_v31 = vld [vmem:[#allocation5 + $0xe8] ss:$16 sps:$4 sm:$0xff]  }
  0x32   :  { %526 = vmatprep.subr.bf16.mxu0 %v1657_v12  ;;  %639 = vmatprep.subr.bf16.mxu1 %v1659_v13  ;;  %v1687_v32 = vld [vmem:[#allocation5 + $0x104] ss:$16 sps:$4 sm:$0xff]   ;;  %v1689_v33 = vld [vmem:[#allocation5 + $0x10c] ss:$16 sps:$4 sm:$0xff]   ;;  %v1691_v34 = vld [vmem:[#allocation5 + $0x100] ss:$16 sps:$4 sm:$0xff]  }
  0x33   :  { %v1692_v35 = vld [vmem:[#allocation5 + $0x108] ss:$16 sps:$4 sm:$0xff]   ;;  %v1693_v36 = vld [vmem:[#allocation5 + $0x124] ss:$16 sps:$4 sm:$0xff]   ;;  %v1695_v37 = vld [vmem:[#allocation5 + $0x12c] ss:$16 sps:$4 sm:$0xff]  }
  0x34   :  { %v1697_v38 = vld [vmem:[#allocation5 + $0x120] ss:$16 sps:$4 sm:$0xff]   ;;  %v1698_v39 = vld [vmem:[#allocation5 + $0x128] ss:$16 sps:$4 sm:$0xff]   ;;  %v1699_v40 = vld [vmem:[#allocation5 + $0x144] ss:$16 sps:$4 sm:$0xff]  }
  0x35   :  { %527 = vmatpush1.bf16.msra.mxu0 %v1661_v14  ;;  %640 = vmatpush1.bf16.msra.mxu1 %v1662_v15  ;;  %v1701_v41 = vld [vmem:[#allocation5 + $0x14c] ss:$16 sps:$4 sm:$0xff]   ;;  %v1703_v42 = vld [vmem:[#allocation5 + $0x140] ss:$16 sps:$4 sm:$0xff]   ;;  %v1704_v43 = vld [vmem:[#allocation5 + $0x148] ss:$16 sps:$4 sm:$0xff]  }
  0x36   :  { %528 = vmatprep.subr.bf16.mxu0 %v1663_v16  ;;  %641 = vmatprep.subr.bf16.mxu1 %v1665_v17  ;;  %v1705_v44 = vld [vmem:[#allocation5 + $0x164] ss:$16 sps:$4 sm:$0xff]   ;;  %v1707_v45 = vld [vmem:[#allocation5 + $0x16c] ss:$16 sps:$4 sm:$0xff]   ;;  %v1709_v46 = vld [vmem:[#allocation5 + $0x160] ss:$16 sps:$4 sm:$0xff]  }
  0x37   :  { %v1710_v47 = vld [vmem:[#allocation5 + $0x168] ss:$16 sps:$4 sm:$0xff]   ;;  %v1737_v48 = vld [vmem:[#allocation2 + $0x4] ss:$8 sps:$4 sm:$0xff]   ;;  %v1715_v51 = vld [vmem:[#allocation5 + $0x180] ss:$16 sps:$4 sm:$0xff]  }
  0x38   :  { %v1711_v49 = vld [vmem:[#allocation5 + $0x184] ss:$16 sps:$4 sm:$0xff]   ;;  %v1713_v50 = vld [vmem:[#allocation5 + $0x18c] ss:$16 sps:$4 sm:$0xff]   ;;  %552 = vmatprep.mubr.bf16.mxu0 %v1737_v48  ;;  %665 = vmatprep.mubr.bf16.mxu1 %v1737_v48  ;;  %v1716_v52 = vld [vmem:[#allocation5 + $0x188] ss:$16 sps:$4 sm:$0xff]  }
  0x39   :  { %529 = vmatpush1.bf16.msra.mxu0 %v1667_v18  ;;  %642 = vmatpush1.bf16.msra.mxu1 %v1668_v19  ;;  %v1717_v53 = vld [vmem:[#allocation5 + $0x1a4] ss:$16 sps:$4 sm:$0xff]   ;;  %v1719_v54 = vld [vmem:[#allocation5 + $0x1ac] ss:$16 sps:$4 sm:$0xff]   ;;  %v1721_v55 = vld [vmem:[#allocation5 + $0x1a0] ss:$16 sps:$4 sm:$0xff]  }
  0x3a   :  { %530 = vmatprep.subr.bf16.mxu0 %v1669_v20  ;;  %643 = vmatprep.subr.bf16.mxu1 %v1671_v21  ;;  %v1722_v56 = vld [vmem:[#allocation5 + $0x1a8] ss:$16 sps:$4 sm:$0xff]   ;;  %v1723_v57 = vld [vmem:[#allocation5 + $0x1c4] ss:$16 sps:$4 sm:$0xff]   ;;  %v1725_v58 = vld [vmem:[#allocation5 + $0x1cc] ss:$16 sps:$4 sm:$0xff]  }
  0x3b   :  { %v1727_v59 = vld [vmem:[#allocation5 + $0x1c0] ss:$16 sps:$4 sm:$0xff]   ;;  %v1728_v60 = vld [vmem:[#allocation5 + $0x1c8] ss:$16 sps:$4 sm:$0xff]   ;;  %v1729_v61 = vld [vmem:[#allocation5 + $0x1e4] ss:$16 sps:$4 sm:$0xff]  }
  0x3c   :  { %v1731_v62 = vld [vmem:[#allocation5 + $0x1ec] ss:$16 sps:$4 sm:$0xff]   ;;  %v1733_v63 = vld [vmem:[#allocation5 + $0x1e0] ss:$16 sps:$4 sm:$0xff]   ;;  %v1734_v0 = vld [vmem:[#allocation5 + $0x1e8] ss:$16 sps:$4 sm:$0xff]  }
  0x3d   :  { %531 = vmatpush1.bf16.msra.mxu0 %v1673_v22  ;;  %644 = vmatpush1.bf16.msra.mxu1 %v1674_v23  ;;  %v1735_v1 = vld [vmem:[#allocation2] ss:$8 sps:$4 sm:$0xff]   ;;  %v1738_v2 = vld [vmem:[#allocation2 + $0x14] ss:$8 sps:$4 sm:$0xff]   ;;  %v1740_v3 = vld [vmem:[#allocation2 + $0x10] ss:$8 sps:$4 sm:$0xff]  }
  0x3e   :  { %532 = vmatprep.subr.bf16.mxu0 %v1675_v24  ;;  %645 = vmatprep.subr.bf16.mxu1 %v1677_v25  ;;  %v1741_v4 = vld [vmem:[#allocation2 + $0x24] ss:$8 sps:$4 sm:$0xff]   ;;  %v1743_v5 = vld [vmem:[#allocation2 + $0x20] ss:$8 sps:$4 sm:$0xff]   ;;  %v1744_v6 = vld [vmem:[#allocation2 + $0x34] ss:$8 sps:$4 sm:$0xff]  }
  0x3f   :  { %v1746_v7 = vld [vmem:[#allocation2 + $0x30] ss:$8 sps:$4 sm:$0xff]   ;;  %v1747_v8 = vld [vmem:[#allocation2 + $0x44] ss:$8 sps:$4 sm:$0xff]   ;;  %v1749_v9 = vld [vmem:[#allocation2 + $0x40] ss:$8 sps:$4 sm:$0xff]  }
  0x40   :  { %v1750_v10 = vld [vmem:[#allocation2 + $0x54] ss:$8 sps:$4 sm:$0xff]   ;;  %v1752_v11 = vld [vmem:[#allocation2 + $0x50] ss:$8 sps:$4 sm:$0xff]   ;;  %v1753_v12 = vld [vmem:[#allocation2 + $0x64] ss:$8 sps:$4 sm:$0xff]  }
  0x41   :  { %533 = vmatpush1.bf16.msra.mxu0 %v1679_v26  ;;  %646 = vmatpush1.bf16.msra.mxu1 %v1680_v27  ;;  %v1755_v13 = vld [vmem:[#allocation2 + $0x60] ss:$8 sps:$4 sm:$0xff]   ;;  %v1756_v14 = vld [vmem:[#allocation2 + $0x74] ss:$8 sps:$4 sm:$0xff]   ;;  %v1758_v15 = vld [vmem:[#allocation2 + $0x70] ss:$8 sps:$4 sm:$0xff]  }
  0x42   :  { %534 = vmatprep.subr.bf16.mxu0 %v1681_v28  ;;  %647 = vmatprep.subr.bf16.mxu1 %v1683_v29  ;;  %s1841_s1 = smov [#allocation7]  }
  0x43   :  { %s1475_s8 = sshll.u32 %s1841_s1, 4  ;;  %s1476_s8 = int_to_ptr.vmem [resolvable:$true] %s1475_s8 }
  0x44   :  { %s1807_s9 = scalar_lea.vmem %s1476_s8, 4096  ;;  %p1812_p3 = scmp.lt.s32.totalorder %s1476_s8, %s1476_s8 }
  0x45   :  { %535 = vmatpush1.bf16.msra.mxu0 %v1685_v30  ;;  %648 = vmatpush1.bf16.msra.mxu1 %v1686_v31  ;;  %p1808_p2 = scmp.ne.s32.totalorder %s1476_s8, %s1807_s9  ;;  %p1813_p4 = scmp.lt.s32.totalorder %s1807_s9, %s1807_s9 }
  0x46   :  { %536 = vmatprep.subr.bf16.mxu0 %v1687_v32  ;;  %649 = vmatprep.subr.bf16.mxu1 %v1689_v33 }
  0x47   :  { %p1814_p5 = por %p1813_p4, %p1812_p3 }
  0x49   :  { %537 = vmatpush1.bf16.msra.mxu0 %v1691_v34  ;;  %650 = vmatpush1.bf16.msra.mxu1 %v1692_v35  ;;  %p1815_p6 = pnand %p1814_p5, %p1808_p2 }
  0x4a   :  { %538 = vmatprep.subr.bf16.mxu0 %v1693_v36  ;;  %651 = vmatprep.subr.bf16.mxu1 %v1695_v37 }
  0x4d   :  { %539 = vmatpush1.bf16.msra.mxu0 %v1697_v38  ;;  %652 = vmatpush1.bf16.msra.mxu1 %v1698_v39 }
  0x4e   :  { %540 = vmatprep.subr.bf16.mxu0 %v1699_v40  ;;  %653 = vmatprep.subr.bf16.mxu1 %v1701_v41 }
  0x51   :  { %541 = vmatpush1.bf16.msra.mxu0 %v1703_v42  ;;  %654 = vmatpush1.bf16.msra.mxu1 %v1704_v43 }
  0x52   :  { %542 = vmatprep.subr.bf16.mxu0 %v1705_v44  ;;  %655 = vmatprep.subr.bf16.mxu1 %v1707_v45 }
  0x55   :  { %543 = vmatpush1.bf16.msra.mxu0 %v1709_v46  ;;  %656 = vmatpush1.bf16.msra.mxu1 %v1710_v47 }
  0x56   :  { %544 = vmatprep.subr.bf16.mxu0 %v1711_v49  ;;  %657 = vmatprep.subr.bf16.mxu1 %v1713_v50 }
  0x59   :  { %545 = vmatpush1.bf16.msra.mxu0 %v1715_v51  ;;  %658 = vmatpush1.bf16.msra.mxu1 %v1716_v52 }
  0x5a   :  { %546 = vmatprep.subr.bf16.mxu0 %v1717_v53  ;;  %659 = vmatprep.subr.bf16.mxu1 %v1719_v54 }
  0x5d   :  { %547 = vmatpush1.bf16.msra.mxu0 %v1721_v55  ;;  %660 = vmatpush1.bf16.msra.mxu1 %v1722_v56 }
  0x5e   :  { %548 = vmatprep.subr.bf16.mxu0 %v1723_v57  ;;  %661 = vmatprep.subr.bf16.mxu1 %v1725_v58 }
  0x61   :  { %549 = vmatpush1.bf16.msra.mxu0 %v1727_v59  ;;  %662 = vmatpush1.bf16.msra.mxu1 %v1728_v60 }
  0x62   :  { %550 = vmatprep.subr.bf16.mxu0 %v1729_v61  ;;  %663 = vmatprep.subr.bf16.mxu1 %v1731_v62 }
  0x65   :  { %551 = vmatpush1.bf16.msra.mxu0 %v1733_v63  ;;  %664 = vmatpush1.bf16.msra.mxu1 %v1734_v0 }
  0x68   :  { %553 = vmatmul.mubr.bf16.vlgmr.msra.gmra.mrb[0].mxu0 %v1735_v1  ;;  %666 = vmatmul.mubr.bf16.vlgmr.msra.gmra.mrb[0].mxu1 %v1735_v1 }
  0x69   :  { %562 = vmatprep.mubr.bf16.mxu0 %v1738_v2  ;;  %675 = vmatprep.mubr.bf16.mxu1 %v1738_v2 }
  0x70   :  { %563 = vmatmul.mubr.bf16.gmra.mrb[4].mxu0 %v1740_v3  ;;  %676 = vmatmul.mubr.bf16.gmra.mrb[4].mxu1 %v1740_v3 }
  0x71   :  { %572 = vmatprep.mubr.bf16.mxu0 %v1741_v4  ;;  %685 = vmatprep.mubr.bf16.mxu1 %v1741_v4 }
  0x78   :  { %573 = vmatmul.mubr.bf16.gmra.mrb[8].mxu0 %v1743_v5  ;;  %686 = vmatmul.mubr.bf16.gmra.mrb[8].mxu1 %v1743_v5 }
  0x79   :  { %582 = vmatprep.mubr.bf16.mxu0 %v1744_v6  ;;  %695 = vmatprep.mubr.bf16.mxu1 %v1744_v6 }
  0x80   :  { %583 = vmatmul.mubr.bf16.gmra.mrb[12].mxu0 %v1746_v7  ;;  %696 = vmatmul.mubr.bf16.gmra.mrb[12].mxu1 %v1746_v7 }
  0x81   :  { %592 = vmatprep.mubr.bf16.mxu0 %v1747_v8  ;;  %705 = vmatprep.mubr.bf16.mxu1 %v1747_v8 }
  0x88   :  { %593 = vmatmul.mubr.bf16.gmra.mrb[16].mxu0 %v1749_v9  ;;  %706 = vmatmul.mubr.bf16.gmra.mrb[16].mxu1 %v1749_v9 }
  0x89   :  { %602 = vmatprep.mubr.bf16.mxu0 %v1750_v10  ;;  %715 = vmatprep.mubr.bf16.mxu1 %v1750_v10 }
  0x90   :  { %603 = vmatmul.mubr.bf16.gmra.mrb[20].mxu0 %v1752_v11  ;;  %716 = vmatmul.mubr.bf16.gmra.mrb[20].mxu1 %v1752_v11 }
  0x91   :  { %612 = vmatprep.mubr.bf16.mxu0 %v1753_v12  ;;  %725 = vmatprep.mubr.bf16.mxu1 %v1753_v12 }
  0x98   :  { %613 = vmatmul.mubr.bf16.gmra.mrb[24].mxu0 %v1755_v13  ;;  %726 = vmatmul.mubr.bf16.gmra.mrb[24].mxu1 %v1755_v13 }
  0x99   :  { %622 = vmatprep.mubr.bf16.mxu0 %v1756_v14  ;;  %735 = vmatprep.mubr.bf16.mxu1 %v1756_v14 }
  0xa0   :  { %623 = vmatmul.mubr.bf16.gmra.mrb[28].mxu0 %v1758_v15  ;;  %736 = vmatmul.mubr.bf16.gmra.mrb[28].mxu1 %v1758_v15 }
 0x13b   :  { %v1884_v16 = vpop.f32.mrb[0].mxu0  ;;  %v1886_v17 = vpop.f32.mrb[0].mxu1 }
 0x13c   :  { %v1888_v18 = vpop.f32.mrb[1].mxu0  ;;  %v1890_v19 = vpop.f32.mrb[1].mxu1 }
 0x13d   :  { %v1892_v20 = vpop.f32.mrb[2].mxu0  ;;  %v1894_v21 = vpop.f32.mrb[2].mxu1 }
 0x13e   :  { %v746_v22 = vadd.f32 %v1892_v20, %v1884_v16  ;;  %v772_v23 = vadd.f32 %v1894_v21, %v1886_v17  ;;  %v1900_v24 = vpop.f32.mrb[3].mxu0  ;;  %v1902_v25 = vpop.f32.mrb[3].mxu1 }
 0x13f   :  { %v759_v26 = vadd.f32 %v1900_v24, %v1888_v18  ;;  %v785_v27 = vadd.f32 %v1902_v25, %v1890_v19 }
 0x143   :  { %v1908_v28 = vpop.f32.mrb[4].mxu0  ;;  %v1910_v29 = vpop.f32.mrb[4].mxu1 }
 0x144   :  { %v747_v30 = vadd.f32 %v746_v22, %v1908_v28  ;;  %v773_v31 = vadd.f32 %v772_v23, %v1910_v29  ;;  %v1914_v32 = vpop.f32.mrb[5].mxu0  ;;  %v1916_v33 = vpop.f32.mrb[5].mxu1 }
 0x145   :  { %v760_v34 = vadd.f32 %v759_v26, %v1914_v32  ;;  %v786_v35 = vadd.f32 %v785_v27, %v1916_v33  ;;  %v1920_v36 = vpop.f32.mrb[6].mxu0  ;;  %v1922_v37 = vpop.f32.mrb[6].mxu1 }
 0x146   :  { %v748_v38 = vadd.f32 %v747_v30, %v1920_v36  ;;  %v774_v39 = vadd.f32 %v773_v31, %v1922_v37  ;;  %v1926_v40 = vpop.f32.mrb[7].mxu0  ;;  %v1928_v41 = vpop.f32.mrb[7].mxu1 }
 0x147   :  { %v761_v42 = vadd.f32 %v760_v34, %v1926_v40  ;;  %v787_v43 = vadd.f32 %v786_v35, %v1928_v41 }
 0x14b   :  { %v1932_v44 = vpop.f32.mrb[8].mxu0  ;;  %v1934_v45 = vpop.f32.mrb[8].mxu1 }
 0x14c   :  { %v749_v46 = vadd.f32 %v748_v38, %v1932_v44  ;;  %v775_v47 = vadd.f32 %v774_v39, %v1934_v45  ;;  %v1938_v48 = vpop.f32.mrb[9].mxu0  ;;  %v1940_v49 = vpop.f32.mrb[9].mxu1 }
 0x14d   :  { %v762_v50 = vadd.f32 %v761_v42, %v1938_v48  ;;  %v788_v51 = vadd.f32 %v787_v43, %v1940_v49  ;;  %v1944_v52 = vpop.f32.mrb[10].mxu0  ;;  %v1946_v53 = vpop.f32.mrb[10].mxu1 }
 0x14e   :  { %v750_v54 = vadd.f32 %v749_v46, %v1944_v52  ;;  %v776_v55 = vadd.f32 %v775_v47, %v1946_v53  ;;  %v1950_v56 = vpop.f32.mrb[11].mxu0  ;;  %v1952_v57 = vpop.f32.mrb[11].mxu1 }
 0x14f   :  { %v763_v58 = vadd.f32 %v762_v50, %v1950_v56  ;;  %v789_v59 = vadd.f32 %v788_v51, %v1952_v57 }
 0x153   :  { %v1956_v60 = vpop.f32.mrb[12].mxu0  ;;  %v1958_v61 = vpop.f32.mrb[12].mxu1 }
 0x154   :  { %v751_v62 = vadd.f32 %v750_v54, %v1956_v60  ;;  %v777_v63 = vadd.f32 %v776_v55, %v1958_v61  ;;  %v1962_v0 = vpop.f32.mrb[13].mxu0  ;;  %v1964_v1 = vpop.f32.mrb[13].mxu1 }
 0x155   :  { %v764_v2 = vadd.f32 %v763_v58, %v1962_v0  ;;  %v790_v3 = vadd.f32 %v789_v59, %v1964_v1  ;;  %v1968_v4 = vpop.f32.mrb[14].mxu0  ;;  %v1970_v5 = vpop.f32.mrb[14].mxu1 }
 0x156   :  { %v752_v6 = vadd.f32 %v751_v62, %v1968_v4  ;;  %v778_v7 = vadd.f32 %v777_v63, %v1970_v5  ;;  %v1974_v8 = vpop.f32.mrb[15].mxu0  ;;  %v1976_v9 = vpop.f32.mrb[15].mxu1 }
 0x157   :  { %v765_v10 = vadd.f32 %v764_v2, %v1974_v8  ;;  %v791_v11 = vadd.f32 %v790_v3, %v1976_v9 }
 0x158   :  { %v753_v12 = vrot.slane %v752_v6, 4  ;;  %v779_v13 = vrot.slane %v778_v7, 4 }
 0x159   :  { %v766_v14 = vrot.slane %v765_v10, 4  ;;  %v792_v15 = vrot.slane %v791_v11, 4 }
 0x15a   :  { %v754_v22 = vadd.f32 %v753_v12, %v752_v6  ;;  %v780_v23 = vadd.f32 %v779_v13, %v778_v7  ;;  %v858_v7 = vlaneseq }
 0x15b   :  { %v767_v26 = vadd.f32 %v766_v14, %v765_v10  ;;  %v793_v27 = vadd.f32 %v792_v15, %v791_v11  ;;  %v1980_v30 = vpop.f32.mrb[16].mxu0  ;;  %v1982_v31 = vpop.f32.mrb[16].mxu1 }
 0x15c   :  { %v755_v34 = vrot.slane %v754_v22, 2  ;;  %v781_v35 = vrot.slane %v780_v23, 2  ;;  %v1984_v38 = vpop.f32.mrb[17].mxu0  ;;  %v1986_v39 = vpop.f32.mrb[17].mxu1 }
 0x15d   :  { %v768_v42 = vrot.slane %v767_v26, 2  ;;  %v794_v43 = vrot.slane %v793_v27, 2  ;;  %v1988_v46 = vpop.f32.mrb[18].mxu0  ;;  %v1990_v47 = vpop.f32.mrb[18].mxu1 }
 0x15e   :  { %2640 = vst [vmem:[#allocation11_spill] sm:$0xff] %v1990_v47  ;;  %v756_v50 = vadd.f32 %v755_v34, %v754_v22  ;;  %v782_v51 = vadd.f32 %v781_v35, %v780_v23  ;;  %v798_v54 = vadd.f32 %v1988_v46, %v1980_v30  ;;  %v824_v55 = vadd.f32 %v1990_v47, %v1982_v31  ;;  %v1996_v58 = vpop.f32.mrb[19].mxu0  ;;  %v1998_v59 = vpop.f32.mrb[19].mxu1 }
 0x15f   :  { %2641 = vst [vmem:[#allocation12_spill] sm:$0xff] %v1996_v58  ;;  %2642 = vst [vmem:[#allocation13_spill] sm:$0xff] %v1998_v59  ;;  %v769_v62 = vadd.f32 %v768_v42, %v767_v26  ;;  %v795_v63 = vadd.f32 %v794_v43, %v793_v27  ;;  %v811_v2 = vadd.f32 %v1996_v58, %v1984_v38  ;;  %v859_v23 = vshrl.u32 %v858_v7, 7 }
 0x160   :  { %v837_v3 = vadd.f32 %v1998_v59, %v1986_v39  ;;  %v757_v6 = vrot.slane %v756_v50, 1  ;;  %v783_v10 = vrot.slane %v782_v51, 1 }
 0x161   :  { %v770_v11 = vrot.slane %v769_v62, 1  ;;  %v796_v14 = vrot.slane %v795_v63, 1 }
 0x162   :  { %v758_v12 = vadd.f32 %v757_v6, %v756_v50  ;;  %v784_v42 = vadd.f32 %v783_v10, %v782_v51 }
 0x163   :  { %v771_v13 = vadd.f32 %v770_v11, %v769_v62  ;;  %v2004_v15 = vpop.f32.mrb[20].mxu0  ;;  %v2006_v22 = vpop.f32.mrb[20].mxu1 }
 0x164   :  { %2643 = vst [vmem:[#allocation14_spill] sm:$0xff] %v2004_v15  ;;  %2644 = vst [vmem:[#allocation15_spill] sm:$0xff] %v2006_v22  ;;  %v799_v26 = vadd.f32 %v798_v54, %v2004_v15  ;;  %v825_v27 = vadd.f32 %v824_v55, %v2006_v22  ;;  %v2010_v34 = vpop.f32.mrb[21].mxu0  ;;  %v2012_v35 = vpop.f32.mrb[21].mxu1  ;;  %v797_v22 = vadd.f32 %v796_v14, %v795_v63 }
 0x165   :  { %2645 = vst [vmem:[#allocation16_spill] sm:$0xff] %v2010_v34  ;;  %2646 = vst [vmem:[#allocation17_spill] sm:$0xff] %v2012_v35  ;;  %v850_v43 = vadd.f32 %v771_v13, %v758_v12  ;;  %v812_v59 = vadd.f32 %v811_v2, %v2010_v34  ;;  %v838_v50 = vadd.f32 %v837_v3, %v2012_v35  ;;  %v2016_v62 = vpop.f32.mrb[22].mxu0  ;;  %v2018_v6 = vpop.f32.mrb[22].mxu1  ;;  %v2028_v3 = vsub.s32 0, %v859_v23 }
 0x166   :  { %2647 = vst [vmem:[#allocation18_spill] sm:$0xff] %v2016_v62  ;;  %2648 = vst [vmem:[#allocation19_spill] sm:$0xff] %v2018_v6  ;;  %v800_v7 = vadd.f32 %v799_v26, %v2016_v62  ;;  %v826_v54 = vadd.f32 %v825_v27, %v2018_v6  ;;  %v2022_v11 = vpop.f32.mrb[23].mxu0  ;;  %v2024_v55 = vpop.f32.mrb[23].mxu1 }
 0x167   :  { %2649 = vst [vmem:[#allocation20_spill] sm:$0xff] %v2022_v11  ;;  %2650 = vst [vmem:[#allocation21_spill] sm:$0xff] %v2024_v55  ;;  %v852_v15 = vadd.f32 %v850_v43, %v784_v42  ;;  %v813_v51 = vadd.f32 %v812_v59, %v2022_v11  ;;  %v839_v2 = vadd.f32 %v838_v50, %v2024_v55 }
 0x168   :  { %2651 = vst [vmem:[#allocation22_spill] sm:$0xff] %v2028_v3 }
 0x169   :  { %v854_v10 = vadd.f32 %v852_v15, %v797_v22 }
 0x16b   :  { %v856_v12 = vmul.f32 0.00390625, %v854_v10  ;;  %v2030_v13 = vpop.f32.mrb[24].mxu0  ;;  %v2032_v35 = vpop.f32.mrb[24].mxu1 }
 0x16c   :  { %2652 = vst [vmem:[#allocation23_spill] sm:$0xff] %v2030_v13  ;;  %2653 = vst [vmem:[#allocation24_spill] sm:$0xff] %v2032_v35  ;;  %v801_v26 = vadd.f32 %v800_v7, %v2030_v13  ;;  %v827_v27 = vadd.f32 %v826_v54, %v2032_v35  ;;  %v2036_v6 = vpop.f32.mrb[25].mxu0  ;;  %v2038_v63 = vpop.f32.mrb[25].mxu1 }
 0x16d   :  { %2654 = vst [vmem:[#allocation25_spill] sm:$0xff] %v2036_v6  ;;  %2655 = vst [vmem:[#allocation26_spill] sm:$0xff] %v2038_v63  ;;  %v861_v59 = vrot.slane %v856_v12, %v2028_v3  ;;  %v2042_v14 = vadd.f32 %v813_v51, %v2036_v6  ;;  %v2045_v15 = vadd.f32 %v839_v2, %v2038_v63  ;;  %v2047_v22 = vpop.f32.mrb[26].mxu0  ;;  %v2049_v23 = vpop.f32.mrb[26].mxu1 }
 0x16e   :  { %2656 = vst [vmem:[#allocation27_spill] sm:$0xff] %v2047_v22  ;;  %2657 = vst [vmem:[#allocation28_spill] sm:$0xff] %v2049_v23  ;;  %v2052_v42 = vadd.f32 %v801_v26, %v2047_v22  ;;  %v2055_v43 = vadd.f32 %v827_v27, %v2049_v23  ;;  %v2057_v50 = vpop.f32.mrb[27].mxu0  ;;  %v2059_v7 = vpop.f32.mrb[27].mxu1 }
 0x16f   :  { %v2062_v54 = vsub.f32 %v1884_v16, %v861_v59  ;;  %v2065_v51 = vsub.f32 %v1888_v18, %v861_v59  ;;  %v2068_v2 = vsub.f32 %v1886_v17, %v861_v59  ;;  %v2071_v10 = vsub.f32 %v1890_v19, %v861_v59 }
 0x170   :  { %v2074_v12 = vsub.f32 %v1892_v20, %v861_v59  ;;  %v2077_v26 = vsub.f32 %v1900_v24, %v861_v59  ;;  %v2080_v27 = vsub.f32 %v1894_v21, %v861_v59  ;;  %v2083_v16 = vsub.f32 %v1902_v25, %v861_v59 }
 0x171   :  { %2658 = vst [vmem:[#allocation29_spill] sm:$0xff] %v2062_v54  ;;  %2659 = vst [vmem:[#allocation30_spill] sm:$0xff] %v2065_v51  ;;  %v2086_v18 = vsub.f32 %v1908_v28, %v861_v59  ;;  %v2089_v17 = vsub.f32 %v1914_v32, %v861_v59  ;;  %v2092_v19 = vsub.f32 %v1910_v29, %v861_v59 }
 0x172   :  { %2660 = vst [vmem:[#allocation31_spill] sm:$0xff] %v2068_v2  ;;  %2661 = vst [vmem:[#allocation32_spill] sm:$0xff] %v2071_v10  ;;  %v2095_v20 = vsub.f32 %v1916_v33, %v861_v59  ;;  %v2098_v24 = vsub.f32 %v1920_v36, %v861_v59  ;;  %v2101_v21 = vsub.f32 %v1926_v40, %v861_v59 }
 0x173   :  { %2662 = vst [vmem:[#allocation33_spill] sm:$0xff] %v2074_v12  ;;  %2663 = vst [vmem:[#allocation34_spill] sm:$0xff] %v2077_v26  ;;  %v2104_v25 = vsub.f32 %v1922_v37, %v861_v59  ;;  %v2107_v28 = vsub.f32 %v1928_v41, %v861_v59  ;;  %v2110_v32 = vsub.f32 %v1932_v44, %v861_v59  ;;  %v2121_v40 = vpop.f32.mrb[28].mxu0  ;;  %v2123_v23 = vpop.f32.mrb[28].mxu1 }
 0x174   :  { %2664 = vst [vmem:[#allocation35_spill] sm:$0xff] %v2080_v27  ;;  %2665 = vst [vmem:[#allocation36_spill] sm:$0xff] %v2083_v16  ;;  %v2113_v29 = vsub.f32 %v1938_v48, %v861_v59  ;;  %v2116_v33 = vsub.f32 %v1934_v45, %v861_v59  ;;  %v2119_v36 = vsub.f32 %v1940_v49, %v861_v59  ;;  %v2137_v45 = vpop.f32.mrb[29].mxu0  ;;  %v2139_v49 = vpop.f32.mrb[29].mxu1 }
 0x175   :  { %2666 = vst [vmem:[#allocation37_spill] sm:$0xff] %v2086_v18  ;;  %2667 = vst [vmem:[#allocation38_spill] sm:$0xff] %v2089_v17  ;;  %v2126_v37 = vsub.f32 %v1944_v52, %v861_v59  ;;  %v2129_v41 = vsub.f32 %v1950_v56, %v861_v59  ;;  %v2132_v44 = vsub.f32 %v1946_v53, %v861_v59  ;;  %v2153_v53 = vpop.f32.mrb[30].mxu0 }
 0x176   :  { %2668 = vst [vmem:[#allocation39_spill] sm:$0xff] %v2092_v19  ;;  %2669 = vst [vmem:[#allocation40_spill] sm:$0xff] %v2095_v20  ;;  %v2135_v48 = vsub.f32 %v1952_v57, %v861_v59  ;;  %v2142_v22 = vsub.f32 %v1956_v60, %v861_v59  ;;  %v2145_v63 = vsub.f32 %v1962_v0, %v861_v59  ;;  %v2155_v57 = vpop.f32.mrb[30].mxu1 }
 0x177   :  { %2670 = vst [vmem:[#allocation41_spill] sm:$0xff] %v2098_v24  ;;  %2671 = vst [vmem:[#allocation42_spill] sm:$0xff] %v2101_v21  ;;  %v2148_v52 = vsub.f32 %v1958_v61, %v861_v59  ;;  %v2151_v56 = vsub.f32 %v1964_v1, %v861_v59  ;;  %v2158_v35 = vsub.f32 %v1968_v4, %v861_v59  ;;  %v2169_v61 = vpop.f32.mrb[31].mxu0  ;;  %v2171_v1 = vpop.f32.mrb[31].mxu1 }
 0x178   :  { %2672 = vst [vmem:[#allocation43_spill] sm:$0xff] %v2104_v25  ;;  %2673 = vst [vmem:[#allocation44_spill] sm:$0xff] %v2107_v28  ;;  %v2161_v6 = vsub.f32 %v1974_v8, %v861_v59  ;;  %v2164_v60 = vsub.f32 %v1970_v5, %v861_v59  ;;  %v2167_v0 = vsub.f32 %v1976_v9, %v861_v59 }
 0x179   :  { %2674 = vst [vmem:[#allocation45_spill] sm:$0xff] %v2110_v32  ;;  %2675 = vst [vmem:[#allocation46_spill] sm:$0xff] %v2113_v29  ;;  %v930_v13 = vmul.f32 %v2062_v54, %v2062_v54  ;;  %v931_v4 = vmul.f32 %v2065_v51, %v2065_v51  ;;  %v932_v8 = vmul.f32 %v2068_v2, %v2068_v2 }
 0x17a   :  { %2676 = vst [vmem:[#allocation47_spill] sm:$0xff] %v2116_v33  ;;  %2677 = vst [vmem:[#allocation48_spill] sm:$0xff] %v2119_v36  ;;  %v933_v5 = vmul.f32 %v2071_v10, %v2071_v10  ;;  %v934_v9 = vmul.f32 %v2074_v12, %v2074_v12  ;;  %v935_v59 = vmul.f32 %v2077_v26, %v2077_v26 }
 0x17b   :  { %2678 = vst [vmem:[#allocation49_spill] sm:$0xff] %v2126_v37  ;;  %2679 = vst [vmem:[#allocation50_spill] sm:$0xff] %v2129_v41  ;;  %v936_v55 = vmul.f32 %v2080_v27, %v2080_v27  ;;  %v937_v54 = vmul.f32 %v2083_v16, %v2083_v16  ;;  %v938_v51 = vmul.f32 %v2086_v18, %v2086_v18 }
 0x17c   :  { %2680 = vst [vmem:[#allocation51_spill] sm:$0xff] %v2132_v44  ;;  %2681 = vst [vmem:[#allocation52_spill] sm:$0xff] %v2135_v48  ;;  %v939_v2 = vmul.f32 %v2089_v17, %v2089_v17  ;;  %v940_v10 = vmul.f32 %v2092_v19, %v2092_v19  ;;  %v941_v12 = vmul.f32 %v2095_v20, %v2095_v20 }
 0x17d   :  { %2682 = vst [vmem:[#allocation53_spill] sm:$0xff] %v2142_v22  ;;  %2683 = vst [vmem:[#allocation54_spill] sm:$0xff] %v2145_v63  ;;  %v942_v26 = vmul.f32 %v2098_v24, %v2098_v24  ;;  %v943_v27 = vmul.f32 %v2101_v21, %v2101_v21  ;;  %v944_v16 = vmul.f32 %v2104_v25, %v2104_v25 }
 0x17e   :  { %2684 = vst [vmem:[#allocation55_spill] sm:$0xff] %v2148_v52  ;;  %2685 = vst [vmem:[#allocation56_spill] sm:$0xff] %v2151_v56  ;;  %v945_v18 = vmul.f32 %v2107_v28, %v2107_v28  ;;  %v946_v17 = vmul.f32 %v2110_v32, %v2110_v32  ;;  %v947_v19 = vmul.f32 %v2113_v29, %v2113_v29 }
 0x17f   :  { %2686 = vst [vmem:[#allocation57_spill] sm:$0xff] %v2158_v35  ;;  %2687 = vst [vmem:[#allocation58_spill] sm:$0xff] %v2161_v6  ;;  %v948_v20 = vmul.f32 %v2116_v33, %v2116_v33  ;;  %v949_v24 = vmul.f32 %v2119_v36, %v2119_v36  ;;  %v950_v21 = vmul.f32 %v2126_v37, %v2126_v37 }
 0x180   :  { %2688 = vst [vmem:[#allocation59_spill] sm:$0xff] %v2164_v60  ;;  %2689 = vst [vmem:[#allocation60_spill] sm:$0xff] %v2167_v0  ;;  %v951_v25 = vmul.f32 %v2129_v41, %v2129_v41  ;;  %v952_v28 = vmul.f32 %v2132_v44, %v2132_v44  ;;  %v953_v32 = vmul.f32 %v2135_v48, %v2135_v48 }
 0x181   :  { %v954_v29 = vmul.f32 %v2142_v22, %v2142_v22  ;;  %v955_v33 = vmul.f32 %v2145_v63, %v2145_v63  ;;  %v956_v36 = vmul.f32 %v2148_v52, %v2148_v52  ;;  %v957_v37 = vmul.f32 %v2151_v56, %v2151_v56 }
 0x182   :  { %v958_v41 = vmul.f32 %v2158_v35, %v2158_v35  ;;  %v959_v44 = vmul.f32 %v2161_v6, %v2161_v6  ;;  %v960_v48 = vmul.f32 %v2164_v60, %v2164_v60  ;;  %v961_v22 = vmul.f32 %v2167_v0, %v2167_v0 }
 0x183   :  { %v994_v11 = vadd.f32 %v934_v9, %v930_v13  ;;  %v1007_v63 = vadd.f32 %v935_v59, %v931_v4  ;;  %v1020_v62 = vadd.f32 %v936_v55, %v932_v8  ;;  %v1033_v34 = vadd.f32 %v937_v54, %v933_v5 }
 0x184   :  { %v815_v52 = vadd.f32 %v2042_v14, %v2057_v50  ;;  %v841_v56 = vadd.f32 %v2045_v15, %v2059_v7  ;;  %v803_v35 = vadd.f32 %v2052_v42, %v2121_v40  ;;  %v829_v6 = vadd.f32 %v2055_v43, %v2123_v23 }
 0x185   :  { %v995_v60 = vadd.f32 %v994_v11, %v938_v51  ;;  %v1008_v47 = vadd.f32 %v1007_v63, %v939_v2  ;;  %v1021_v58 = vadd.f32 %v1020_v62, %v940_v10  ;;  %v1034_v0 = vadd.f32 %v1033_v34, %v941_v12 }
 0x186   :  { %v816_v13 = vadd.f32 %v815_v52, %v2137_v45  ;;  %v842_v55 = vadd.f32 %v841_v56, %v2139_v49  ;;  %v804_v54 = vadd.f32 %v803_v35, %v2153_v53  ;;  %v830_v14 = vadd.f32 %v829_v6, %v2155_v57 }
 0x187   :  { %v996_v4 = vadd.f32 %v995_v60, %v942_v26  ;;  %v1009_v15 = vadd.f32 %v1008_v47, %v943_v27  ;;  %v1022_v8 = vadd.f32 %v1021_v58, %v944_v16  ;;  %v1035_v5 = vadd.f32 %v1034_v0, %v945_v18 }
 0x188   :  { %v805_v42 = vrot.slane %v804_v54, 4  ;;  %v831_v9 = vrot.slane %v830_v14, 4  ;;  %v817_v43 = vadd.f32 %v816_v13, %v2169_v61  ;;  %v843_v11 = vadd.f32 %v842_v55, %v2171_v1 }
 0x189   :  { %v997_v62 = vadd.f32 %v996_v4, %v946_v17  ;;  %v1010_v34 = vadd.f32 %v1009_v15, %v947_v19  ;;  %v1023_v63 = vadd.f32 %v1022_v8, %v948_v20  ;;  %v1036_v51 = vadd.f32 %v1035_v5, %v949_v24 }
 0x18a   :  { %v806_v2 = vadd.f32 %v805_v42, %v804_v54  ;;  %v832_v10 = vadd.f32 %v831_v9, %v830_v14  ;;  %v818_v12 = vrot.slane %v817_v43, 4  ;;  %v844_v35 = vrot.slane %v843_v11, 4 }
 0x18b   :  { %v998_v52 = vadd.f32 %v997_v62, %v950_v21  ;;  %v1011_v6 = vadd.f32 %v1010_v34, %v951_v25  ;;  %v1024_v26 = vadd.f32 %v1023_v63, %v952_v28  ;;  %v1037_v47 = vadd.f32 %v1036_v51, %v953_v32 }
 0x18c   :  { %v807_v58 = vrot.slane %v806_v2, 2  ;;  %v833_v27 = vrot.slane %v832_v10, 2  ;;  %v819_v16 = vadd.f32 %v818_v12, %v817_v43  ;;  %v845_v18 = vadd.f32 %v844_v35, %v843_v11 }
 0x18d   :  { %v999_v56 = vadd.f32 %v998_v52, %v954_v29  ;;  %v1012_v60 = vadd.f32 %v1011_v6, %v955_v33  ;;  %v1025_v0 = vadd.f32 %v1024_v26, %v956_v36  ;;  %v1038_v59 = vadd.f32 %v1037_v47, %v957_v37 }
 0x18e   :  { %v808_v17 = vadd.f32 %v807_v58, %v806_v2  ;;  %v834_v19 = vadd.f32 %v833_v27, %v832_v10  ;;  %v820_v20 = vrot.slane %v819_v16, 2  ;;  %v846_v24 = vrot.slane %v845_v18, 2 }
 0x18f   :  { %v1000_v13 = vadd.f32 %v999_v56, %v958_v41  ;;  %v1013_v55 = vadd.f32 %v1012_v60, %v959_v44  ;;  %v1026_v54 = vadd.f32 %v1025_v0, %v960_v48  ;;  %v1039_v14 = vadd.f32 %v1038_v59, %v961_v22 }
 0x190   :  { %v809_v21 = vrot.slane %v808_v17, 1  ;;  %v821_v25 = vadd.f32 %v820_v20, %v819_v16  ;;  %v847_v28 = vadd.f32 %v846_v24, %v845_v18  ;;  %v835_v29 = vrot.slane %v834_v19, 1 }
 0x191   :  { %v1001_v32 = vrot.slane %v1000_v13, 4  ;;  %v1014_v4 = vrot.slane %v1013_v55, 4  ;;  %v1027_v15 = vrot.slane %v1026_v54, 4  ;;  %v1040_v8 = vrot.slane %v1039_v14, 4 }
 0x192   :  { %v810_v5 = vadd.f32 %v809_v21, %v808_v17  ;;  %v822_v33 = vrot.slane %v821_v25, 1  ;;  %v848_v11 = vrot.slane %v847_v28, 1  ;;  %v836_v62 = vadd.f32 %v835_v29, %v834_v19 }
 0x193   :  { %v1002_v36 = vadd.f32 %v1001_v32, %v1000_v13  ;;  %v1015_v37 = vadd.f32 %v1014_v4, %v1013_v55  ;;  %v1028_v42 = vadd.f32 %v1027_v15, %v1026_v54  ;;  %v1041_v9 = vadd.f32 %v1040_v8, %v1039_v14  ;;  %v2695_v14 = vld [vmem:[#allocation12_spill] sm:$0xff] }
 0x194   :  { %v823_v43 = vadd.f32 %v822_v33, %v821_v25  ;;  %v849_v12 = vadd.f32 %v848_v11, %v847_v28  ;;  %v2697_v25 = vld [vmem:[#allocation11_spill] sm:$0xff]  ;;  %v2709_v33 = vld [vmem:[#allocation18_spill] sm:$0xff]  ;;  %v2715_v11 = vld [vmem:[#allocation21_spill] sm:$0xff] }
 0x195   :  { %v1003_v41 = vrot.slane %v1002_v36, 2  ;;  %v1016_v44 = vrot.slane %v1015_v37, 2  ;;  %v1029_v48 = vrot.slane %v1028_v42, 2  ;;  %v1042_v22 = vrot.slane %v1041_v9, 2 }
 0x196   :  { %v851_v34 = vadd.f32 %v823_v43, %v810_v5  ;;  %v2707_v5 = vld [vmem:[#allocation17_spill] sm:$0xff] }
 0x197   :  { %v1004_v63 = vadd.f32 %v1003_v41, %v1002_v36  ;;  %v1017_v51 = vadd.f32 %v1016_v44, %v1015_v37  ;;  %v1030_v2 = vadd.f32 %v1029_v48, %v1028_v42  ;;  %v1043_v10 = vadd.f32 %v1042_v22, %v1041_v9  ;;  %v2711_v37 = vld [vmem:[#allocation20_spill] sm:$0xff]  ;;  %v2713_v9 = vld [vmem:[#allocation19_spill] sm:$0xff]  ;;  %v2719_v22 = vld [vmem:[#allocation25_spill] sm:$0xff] }
 0x198   :  { %v853_v35 = vadd.f32 %v851_v34, %v836_v62  ;;  %v2717_v44 = vld [vmem:[#allocation23_spill] sm:$0xff] }
 0x199   :  { %v1005_v52 = vrot.slane %v1004_v63, 1  ;;  %v1018_v6 = vrot.slane %v1017_v51, 1  ;;  %v1031_v26 = vrot.slane %v1030_v2, 1  ;;  %v1044_v16 = vrot.slane %v1043_v10, 1 }
 0x19a   :  { %v855_v47 = vadd.f32 %v853_v35, %v849_v12  ;;  %v2725_v12 = vld [vmem:[#allocation27_spill] sm:$0xff] }
 0x19b   :  { %v1006_v58 = vadd.f32 %v1005_v52, %v1004_v63  ;;  %v1019_v27 = vadd.f32 %v1018_v6, %v1017_v51  ;;  %v1032_v56 = vadd.f32 %v1031_v26, %v1030_v2  ;;  %v1045_v59 = vadd.f32 %v1044_v16, %v1043_v10  ;;  %v2721_v63 = vld [vmem:[#allocation24_spill] sm:$0xff]  ;;  %v2723_v2 = vld [vmem:[#allocation26_spill] sm:$0xff] }
 0x19c   :  { %v857_v18 = vmul.f32 0.00390625, %v855_v47  ;;  %v2726_v6 = vld [vmem:[#allocation28_spill] sm:$0xff] }
 0x19d   :  { %v1098_v60 = vadd.f32 %v1019_v27, %v1006_v58 }
 0x19e   :  { %v865_v0 = vrot.slane %v857_v18, %v2028_v3 }
 0x19f   :  { %v1100_v17 = vadd.f32 %v1098_v60, %v1032_v56 }
 0x1a0   :  { %v2253_v19 = vsub.f32 %v1980_v30, %v865_v0  ;;  %v2256_v20 = vsub.f32 %v1984_v38, %v865_v0  ;;  %v2259_v24 = vsub.f32 %v1982_v31, %v865_v0  ;;  %v2262_v13 = vsub.f32 %v1986_v39, %v865_v0  ;;  %v2699_v30 = vld [vmem:[#allocation13_spill] sm:$0xff]  ;;  %v2701_v38 = vld [vmem:[#allocation14_spill] sm:$0xff]  ;;  %v2703_v31 = vld [vmem:[#allocation16_spill] sm:$0xff] }
 0x1a1   :  { %v1102_v55 = vadd.f32 %v1100_v17, %v1045_v59  ;;  %v2265_v54 = vsub.f32 %v1988_v46, %v865_v0  ;;  %v2268_v21 = vsub.f32 %v2695_v14, %v865_v0  ;;  %v2271_v28 = vsub.f32 %v2697_v25, %v865_v0  ;;  %v2705_v39 = vld [vmem:[#allocation15_spill] sm:$0xff] }
 0x1a2   :  { %2690 = vst [vmem:[#allocation61_spill] sm:$0xff] %v2253_v19  ;;  %2691 = vst [vmem:[#allocation62_spill] sm:$0xff] %v2256_v20  ;;  %v2274_v32 = vsub.f32 %v2699_v30, %v865_v0  ;;  %v2277_v4 = vsub.f32 %v2701_v38, %v865_v0  ;;  %v2280_v15 = vsub.f32 %v2703_v31, %v865_v0 }
 0x1a3   :  { %2692 = vst [vmem:[#allocation63_spill] sm:$0xff] %v2259_v24  ;;  %2693 = vst [vmem:[#allocation64_spill] sm:$0xff] %v2262_v13  ;;  %v2283_v8 = vsub.f32 %v2705_v39, %v865_v0  ;;  %v1104_v46 = vmul.f32 0.00390625, %v1102_v55  ;;  %v2286_v29 = vsub.f32 %v2707_v5, %v865_v0  ;;  %v2289_v36 = vsub.f32 %v2709_v33, %v865_v0 }
 0x1a4   :  { %2694 = vst [vmem:[#allocation65_spill] sm:$0xff] %v2265_v54  ;;  %2696 = vst [vmem:[#allocation12_spill] sm:$0xff] %v2268_v21  ;;  %v2292_v42 = vsub.f32 %v2711_v37, %v865_v0  ;;  %v2295_v43 = vsub.f32 %v2713_v9, %v865_v0  ;;  %v2298_v41 = vsub.f32 %v2715_v11, %v865_v0 }
 0x1a5   :  { %2698 = vst [vmem:[#allocation11_spill] sm:$0xff] %v2271_v28  ;;  %2700 = vst [vmem:[#allocation13_spill] sm:$0xff] %v2274_v32  ;;  %v2301_v48 = vsub.f32 %v2717_v44, %v865_v0  ;;  %v2304_v62 = vsub.f32 %v2719_v22, %v865_v0  ;;  %v1106_v34 = vadd.f32 1e-05, %v1104_v46  ;;  %v2307_v51 = vsub.f32 %v2721_v63, %v865_v0 }
 0x1a6   :  { %2702 = vst [vmem:[#allocation14_spill] sm:$0xff] %v2277_v4  ;;  %2704 = vst [vmem:[#allocation16_spill] sm:$0xff] %v2280_v15  ;;  %v2310_v10 = vsub.f32 %v2723_v2, %v865_v0  ;;  %v2313_v35 = vsub.f32 %v2725_v12, %v865_v0  ;;  %v2316_v52 = vsub.f32 %v2057_v50, %v865_v0 }
 0x1a7   :  { %2706 = vst [vmem:[#allocation15_spill] sm:$0xff] %v2283_v8  ;;  %2708 = vst [vmem:[#allocation17_spill] sm:$0xff] %v2286_v29  ;;  %v2319_v26 = vsub.f32 %v2726_v6, %v865_v0  ;;  %v2322_v47 = vsub.f32 %v2059_v7, %v865_v0  ;;  %v2325_v58 = vsub.f32 %v2121_v40, %v865_v0  ;;  %1759 = vrsqrt.f32 %v1106_v34  ;;  %v2737_v6 = vld [vmem:[#allocation59_spill] sm:$0xff] }
 0x1a8   :  { %2710 = vst [vmem:[#allocation18_spill] sm:$0xff] %v2289_v36  ;;  %2712 = vst [vmem:[#allocation20_spill] sm:$0xff] %v2292_v42  ;;  %v2328_v27 = vsub.f32 %v2137_v45, %v865_v0  ;;  %v2331_v16 = vsub.f32 %v2123_v23, %v865_v0  ;;  %v2334_v18 = vsub.f32 %v2139_v49, %v865_v0 }
 0x1a9   :  { %2714 = vst [vmem:[#allocation19_spill] sm:$0xff] %v2295_v43  ;;  %2716 = vst [vmem:[#allocation21_spill] sm:$0xff] %v2298_v41  ;;  %v2337_v50 = vsub.f32 %v2153_v53, %v865_v0  ;;  %v2340_v56 = vsub.f32 %v2169_v61, %v865_v0  ;;  %v2343_v7 = vsub.f32 %v2155_v57, %v865_v0 }
 0x1aa   :  { %2718 = vst [vmem:[#allocation23_spill] sm:$0xff] %v2301_v48  ;;  %2720 = vst [vmem:[#allocation25_spill] sm:$0xff] %v2304_v62  ;;  %v2346_v40 = vsub.f32 %v2171_v1, %v865_v0  ;;  %v962_v45 = vmul.f32 %v2253_v19, %v2253_v19  ;;  %v963_v23 = vmul.f32 %v2256_v20, %v2256_v20 }
 0x1ab   :  { %2722 = vst [vmem:[#allocation24_spill] sm:$0xff] %v2307_v51  ;;  %2724 = vst [vmem:[#allocation26_spill] sm:$0xff] %v2310_v10  ;;  %v964_v49 = vmul.f32 %v2259_v24, %v2259_v24  ;;  %v965_v53 = vmul.f32 %v2262_v13, %v2262_v13  ;;  %v966_v61 = vmul.f32 %v2265_v54, %v2265_v54 }
 0x1ac   :  { %2727 = vst [vmem:[#allocation27_spill] sm:$0xff] %v2325_v58  ;;  %2728 = vst [vmem:[#allocation28_spill] sm:$0xff] %v2328_v27  ;;  %v967_v57 = vmul.f32 %v2268_v21, %v2268_v21  ;;  %v968_v1 = vmul.f32 %v2271_v28, %v2271_v28  ;;  %v969_v60 = vmul.f32 %v2274_v32, %v2274_v32  ;;  %v2759_v21 = vld [vmem:[#allocation49_spill] sm:$0xff] }
 0x1ad   :  { %2729 = vst [vmem:[#allocation66_spill] sm:$0xff] %v2331_v16  ;;  %2730 = vst [vmem:[#allocation67_spill] sm:$0xff] %v2334_v18  ;;  %v970_v0 = vmul.f32 %v2277_v4, %v2277_v4  ;;  %v971_v59 = vmul.f32 %v2280_v15, %v2280_v15  ;;  %v972_v17 = vmul.f32 %v2283_v8, %v2283_v8 }
 0x1ae   :  { %2731 = vst [vmem:[#allocation68_spill] sm:$0xff] %v2337_v50  ;;  %2732 = vst [vmem:[#allocation69_spill] sm:$0xff] %v2340_v56  ;;  %v973_v55 = vmul.f32 %v2286_v29, %v2286_v29  ;;  %v2374_v14 = vmul.f32 %v2289_v36, %v2289_v36  ;;  %v2378_v25 = vmul.f32 %v2292_v42, %v2292_v42  ;;  %v2751_v36 = vld [vmem:[#allocation41_spill] sm:$0xff]  ;;  %v2752_v29 = vld [vmem:[#allocation42_spill] sm:$0xff] }
 0x1af   :  { %2733 = vst [vmem:[#allocation70_spill] sm:$0xff] %v2343_v7  ;;  %2734 = vst [vmem:[#allocation71_spill] sm:$0xff] %v2346_v40  ;;  %v2382_v30 = vmul.f32 %v2295_v43, %v2295_v43  ;;  %v2386_v38 = vmul.f32 %v2298_v41, %v2298_v41  ;;  %v2390_v31 = vmul.f32 %v2301_v48, %v2301_v48  ;;  %v2750_v43 = vld [vmem:[#allocation40_spill] sm:$0xff]  ;;  %v2768_v40 = vld [vmem:[#allocation58_spill] sm:$0xff] }
 0x1b0   :  { %v1046_v46 = vadd.f32 %v966_v61, %v962_v45  ;;  %v1059_v5 = vadd.f32 %v967_v57, %v963_v23  ;;  %v1072_v33 = vadd.f32 %v968_v1, %v964_v49  ;;  %v1085_v37 = vadd.f32 %v969_v60, %v965_v53  ;;  %v2738_v23 = vld [vmem:[#allocation60_spill] sm:$0xff]  ;;  %v2739_v53 = vld [vmem:[#allocation29_spill] sm:$0xff]  ;;  %v2740_v57 = vld [vmem:[#allocation30_spill] sm:$0xff] }
 0x1b1   :  { %v1760_v39 = vpop.eup %1759  ;;  %v2395_v11 = vmul.f32 %v2304_v62, %v2304_v62  ;;  %v2399_v44 = vmul.f32 %v2307_v51, %v2307_v51  ;;  %v2403_v22 = vmul.f32 %v2310_v10, %v2310_v10  ;;  %v2741_v60 = vld [vmem:[#allocation31_spill] sm:$0xff]  ;;  %v2747_v51 = vld [vmem:[#allocation37_spill] sm:$0xff]  ;;  %v2748_v62 = vld [vmem:[#allocation38_spill] sm:$0xff] }
 0x1b2   :  { %v1113_v9 = vrot.slane %v1760_v39, %v2028_v3  ;;  %v2405_v34 = vadd.f32 %v1046_v46, %v970_v0  ;;  %v2407_v63 = vadd.f32 %v1059_v5, %v971_v59  ;;  %v2409_v2 = vadd.f32 %v1072_v33, %v972_v17  ;;  %v2742_v0 = vld [vmem:[#allocation32_spill] sm:$0xff]  ;;  %v2743_v17 = vld [vmem:[#allocation33_spill] sm:$0xff] }
 0x1b3   :  { %2735 = vst [vmem:[#allocation72_spill] sm:$0xff] %v2399_v44  ;;  %2736 = vst [vmem:[#allocation73_spill] sm:$0xff] %v2403_v22  ;;  %v2411_v12 = vadd.f32 %v1085_v37, %v973_v55  ;;  %v2744_v55 = vld [vmem:[#allocation34_spill] sm:$0xff] }
 0x1b4   :  { %v1148_v45 = vmul.f32 %v1113_v9, %v2737_v6  ;;  %v1149_v49 = vmul.f32 %v1113_v9, %v2738_v23  ;;  %v2416_v61 = vmul.f32 %v1113_v9, %v2739_v53  ;;  %v2419_v1 = vmul.f32 %v1113_v9, %v2740_v57  ;;  %v2745_v6 = vld [vmem:[#allocation35_spill] sm:$0xff]  ;;  %v2746_v53 = vld [vmem:[#allocation36_spill] sm:$0xff] }
 0x1b5   :  { %v2422_v39 = vmul.f32 %v1113_v9, %v2741_v60  ;;  %v2425_v59 = vmul.f32 %v1113_v9, %v2742_v0  ;;  %v2428_v46 = vmul.f32 %v1113_v9, %v2743_v17  ;;  %v1123_v5 = vmul.f32 %v1113_v9, %v2744_v55  ;;  %v2749_v60 = vld [vmem:[#allocation39_spill] sm:$0xff] }
 0x1b6   :  { %v1212_v33 = vmax.f32 %v1148_v45, 0.0  ;;  %v1213_v37 = vmax.f32 %v1149_v49, 0.0  ;;  %v1124_v23 = vmul.f32 %v1113_v9, %v2745_v6  ;;  %v1125_v10 = vmul.f32 %v1113_v9, %v2746_v53  ;;  %v2753_v55 = vld [vmem:[#allocation43_spill] sm:$0xff]  ;;  %v2754_v49 = vld [vmem:[#allocation44_spill] sm:$0xff]  ;;  %v2755_v6 = vld [vmem:[#allocation45_spill] sm:$0xff] }
 0x1b7   :  { %v1126_v57 = vmul.f32 %v1113_v9, %v2747_v51  ;;  %v1127_v48 = vmul.f32 %v1113_v9, %v2748_v62  ;;  %v1128_v41 = vmul.f32 %v1113_v9, %v2749_v60  ;;  %v1129_v0 = vmul.f32 %v1113_v9, %v2750_v43  ;;  %v2756_v53 = vld [vmem:[#allocation46_spill] sm:$0xff]  ;;  %v2757_v51 = vld [vmem:[#allocation47_spill] sm:$0xff]  ;;  %v2758_v62 = vld [vmem:[#allocation48_spill] sm:$0xff] }
 0x1b8   :  { %v1615_v42 = vpack.c.bf16 %v1213_v37, %v1212_v33  ;;  %v1130_v17 = vmul.f32 %v1113_v9, %v2751_v36  ;;  %v1131_v8 = vmul.f32 %v1113_v9, %v2752_v29  ;;  %v1132_v45 = vmul.f32 %v1113_v9, %v2753_v55  ;;  %v2760_v33 = vld [vmem:[#allocation50_spill] sm:$0xff]  ;;  %v2761_v36 = vld [vmem:[#allocation51_spill] sm:$0xff]  ;;  %v2762_v29 = vld [vmem:[#allocation52_spill] sm:$0xff] }
 0x1b9   :  { %v1133_v15 = vmul.f32 %v1113_v9, %v2754_v49  ;;  %v1134_v4 = vmul.f32 %v1113_v9, %v2755_v6  ;;  %v1135_v32 = vmul.f32 %v1113_v9, %v2756_v53  ;;  %v1136_v28 = vmul.f32 %v1113_v9, %v2757_v51  ;;  %v2763_v55 = vld [vmem:[#allocation53_spill] sm:$0xff]  ;;  %v2764_v49 = vld [vmem:[#allocation54_spill] sm:$0xff]  ;;  %v2765_v6 = vld [vmem:[#allocation55_spill] sm:$0xff] }
 0x1ba   :  { %1453 = vst [vmem:[#allocation7 + $0x78] sm:$0xff] %v1615_v42  ;;  %v1137_v60 = vmul.f32 %v1113_v9, %v2758_v62  ;;  %v1138_v43 = vmul.f32 %v1113_v9, %v2759_v21  ;;  %v1139_v37 = vmul.f32 %v1113_v9, %v2760_v33  ;;  %v1140_v54 = vmul.f32 %v1113_v9, %v2761_v36  ;;  %v2766_v53 = vld [vmem:[#allocation56_spill] sm:$0xff]  ;;  %v2767_v51 = vld [vmem:[#allocation57_spill] sm:$0xff] }
 0x1bb   :  { %v1141_v13 = vmul.f32 %v1113_v9, %v2762_v29  ;;  %v1142_v24 = vmul.f32 %v1113_v9, %v2763_v55  ;;  %v1143_v20 = vmul.f32 %v1113_v9, %v2764_v49  ;;  %v1144_v19 = vmul.f32 %v1113_v9, %v2765_v6 }
 0x1bc   :  { %v1145_v3 = vmul.f32 %v1113_v9, %v2766_v53  ;;  %v1146_v42 = vmul.f32 %v1113_v9, %v2767_v51  ;;  %v1147_v62 = vmul.f32 %v1113_v9, %v2768_v40  ;;  %v1182_v21 = vmax.f32 %v2416_v61, 0.0 }
 0x1bd   :  { %v1183_v33 = vmax.f32 %v2419_v1, 0.0  ;;  %v1184_v36 = vmax.f32 %v2422_v39, 0.0  ;;  %v1185_v29 = vmax.f32 %v2425_v59, 0.0  ;;  %v1186_v55 = vmax.f32 %v2428_v46, 0.0 }
 0x1be   :  { %v1187_v7 = vmax.f32 %v1123_v5, 0.0  ;;  %v1188_v49 = vmax.f32 %v1124_v23, 0.0  ;;  %v1189_v56 = vmax.f32 %v1125_v10, 0.0  ;;  %v1190_v6 = vmax.f32 %v1126_v57, 0.0 }
 0x1bf   :  { %v1191_v50 = vmax.f32 %v1127_v48, 0.0  ;;  %v1192_v53 = vmax.f32 %v1128_v41, 0.0  ;;  %v1193_v18 = vmax.f32 %v1129_v0, 0.0  ;;  %v1194_v51 = vmax.f32 %v1130_v17, 0.0 }
 0x1c0   :  { %v1195_v16 = vmax.f32 %v1131_v8, 0.0  ;;  %v1196_v40 = vmax.f32 %v1132_v45, 0.0  ;;  %v1197_v9 = vmax.f32 %v1133_v15, 0.0  ;;  %v1198_v61 = vmax.f32 %v1134_v4, 0.0 }
 0x1c1   :  { %v1199_v27 = vmax.f32 %v1135_v32, 0.0  ;;  %v1200_v1 = vmax.f32 %v1136_v28, 0.0  ;;  %v1201_v58 = vmax.f32 %v1137_v60, 0.0  ;;  %v1202_v39 = vmax.f32 %v1138_v43, 0.0 }
 0x1c2   :  { %v1203_v22 = vmax.f32 %v1139_v37, 0.0  ;;  %v1204_v59 = vmax.f32 %v1140_v54, 0.0  ;;  %v1205_v44 = vmax.f32 %v1141_v13, 0.0  ;;  %v1206_v46 = vmax.f32 %v1142_v24, 0.0 }
 0x1c3   :  { %v1207_v5 = vmax.f32 %v1143_v20, 0.0  ;;  %v1208_v23 = vmax.f32 %v1144_v19, 0.0  ;;  %v1209_v10 = vmax.f32 %v1145_v3, 0.0  ;;  %v1210_v57 = vmax.f32 %v1146_v42, 0.0  ;;  %v2774_v42 = vld [vmem:[#allocation67_spill] sm:$0xff] }
 0x1c4   :  { %v1211_v48 = vmax.f32 %v1147_v62, 0.0  ;;  %v1600_v41 = vpack.c.bf16 %v1183_v33, %v1182_v21  ;;  %v1601_v0 = vpack.c.bf16 %v1185_v29, %v1184_v36  ;;  %v1602_v17 = vpack.c.bf16 %v1187_v7, %v1186_v55  ;;  %v2775_v36 = vld [vmem:[#allocation68_spill] sm:$0xff]  ;;  %v2776_v55 = vld [vmem:[#allocation69_spill] sm:$0xff] }
 0x1c5   :  { %v1603_v8 = vpack.c.bf16 %v1189_v56, %v1188_v49  ;;  %v1604_v45 = vpack.c.bf16 %v1191_v50, %v1190_v6  ;;  %v1605_v15 = vpack.c.bf16 %v1193_v18, %v1192_v53  ;;  %v1606_v4 = vpack.c.bf16 %v1195_v16, %v1194_v51  ;;  %v2777_v6 = vld [vmem:[#allocation70_spill] sm:$0xff]  ;;  %v2778_v51 = vld [vmem:[#allocation71_spill] sm:$0xff] }
 0x1c6   :  { %v1607_v32 = vpack.c.bf16 %v1197_v9, %v1196_v40  ;;  %v1608_v28 = vpack.c.bf16 %v1199_v27, %v1198_v61  ;;  %v1609_v60 = vpack.c.bf16 %v1201_v58, %v1200_v1  ;;  %v1610_v43 = vpack.c.bf16 %v1203_v22, %v1202_v39  ;;  %1438 = vst [vmem:[#allocation7] sm:$0xff] %v1600_v41  ;;  %v2771_v22 = vld [vmem:[#allocation27_spill] sm:$0xff] }
 0x1c7   :  { %1439 = vst [vmem:[#allocation7 + $0x8] sm:$0xff] %v1601_v0  ;;  %1440 = vst [vmem:[#allocation7 + $0x10] sm:$0xff] %v1602_v17  ;;  %v1611_v24 = vpack.c.bf16 %v1205_v44, %v1204_v59  ;;  %v1612_v20 = vpack.c.bf16 %v1207_v5, %v1206_v46  ;;  %v1613_v19 = vpack.c.bf16 %v1209_v10, %v1208_v23 }
 0x1c8   :  { %v1614_v3 = vpack.c.bf16 %v1211_v48, %v1210_v57  ;;  %1441 = vst [vmem:[#allocation7 + $0x18] sm:$0xff] %v1603_v8  ;;  %1442 = vst [vmem:[#allocation7 + $0x20] sm:$0xff] %v1604_v45  ;;  %v1048_v13 = vadd.f32 %v2405_v34, %v2374_v14  ;;  %v1061_v54 = vadd.f32 %v2407_v63, %v2378_v25  ;;  %v2769_v25 = vld [vmem:[#allocation72_spill] sm:$0xff] }
 0x1c9   :  { %1443 = vst [vmem:[#allocation7 + $0x28] sm:$0xff] %v1605_v15  ;;  %1444 = vst [vmem:[#allocation7 + $0x30] sm:$0xff] %v1606_v4  ;;  %v1074_v58 = vadd.f32 %v2409_v2, %v2382_v30  ;;  %v1087_v27 = vadd.f32 %v2411_v12, %v2386_v38  ;;  %v982_v16 = vmul.f32 %v2313_v35, %v2313_v35  ;;  %v2770_v38 = vld [vmem:[#allocation73_spill] sm:$0xff]  ;;  %v2772_v63 = vld [vmem:[#allocation28_spill] sm:$0xff] }
 0x1ca   :  { %1445 = vst [vmem:[#allocation7 + $0x38] sm:$0xff] %v1607_v32  ;;  %1446 = vst [vmem:[#allocation7 + $0x40] sm:$0xff] %v1608_v28  ;;  %v983_v18 = vmul.f32 %v2316_v52, %v2316_v52  ;;  %v984_v50 = vmul.f32 %v2319_v26, %v2319_v26  ;;  %v985_v56 = vmul.f32 %v2322_v47, %v2322_v47  ;;  %v2773_v12 = vld [vmem:[#allocation66_spill] sm:$0xff] }
 0x1cb   :  { %1447 = vst [vmem:[#allocation7 + $0x48] sm:$0xff] %v1609_v60  ;;  %1448 = vst [vmem:[#allocation7 + $0x50] sm:$0xff] %v1610_v43  ;;  %v1049_v7 = vadd.f32 %v1048_v13, %v2390_v31  ;;  %v1062_v14 = vadd.f32 %v1061_v54, %v2395_v11  ;;  %v1075_v30 = vadd.f32 %v1074_v58, %v2769_v25 }
 0x1cc   :  { %1449 = vst [vmem:[#allocation7 + $0x58] sm:$0xff] %v1611_v24  ;;  %1450 = vst [vmem:[#allocation7 + $0x60] sm:$0xff] %v1612_v20  ;;  %v1088_v44 = vadd.f32 %v1087_v27, %v2770_v38  ;;  %v986_v34 = vmul.f32 %v2771_v22, %v2771_v22  ;;  %v987_v2 = vmul.f32 %v2772_v63, %v2772_v63  ;;  %v2779_v38 = vld [vmem:[#allocation22_spill] sm:$0xff] }
 0x1cd   :  { %1451 = vst [vmem:[#allocation7 + $0x68] sm:$0xff] %v1613_v19  ;;  %1452 = vst [vmem:[#allocation7 + $0x70] sm:$0xff] %v1614_v3  ;;  %v988_v37 = vmul.f32 %v2773_v12, %v2773_v12  ;;  %v989_v62 = vmul.f32 %v2774_v42, %v2774_v42  ;;  %v1050_v21 = vadd.f32 %v1049_v7, %v982_v16 }
 0x1ce   :  { %v1063_v31 = vadd.f32 %v1062_v14, %v983_v18  ;;  %v1076_v33 = vadd.f32 %v1075_v30, %v984_v50  ;;  %v1089_v11 = vadd.f32 %v1088_v44, %v985_v56  ;;  %v990_v29 = vmul.f32 %v2775_v36, %v2775_v36 }
 0x1cf   :  { %v991_v49 = vmul.f32 %v2776_v55, %v2776_v55  ;;  %v992_v53 = vmul.f32 %v2777_v6, %v2777_v6  ;;  %v993_v40 = vmul.f32 %v2778_v51, %v2778_v51  ;;  %v1051_v9 = vadd.f32 %v1050_v21, %v986_v34  ;;  %v2781_v21 = vld [vmem:[#allocation62_spill] sm:$0xff] }
 0x1d0   :  { %v1064_v61 = vadd.f32 %v1063_v31, %v987_v2  ;;  %v1077_v1 = vadd.f32 %v1076_v33, %v988_v37  ;;  %v1090_v39 = vadd.f32 %v1089_v11, %v989_v62  ;;  %v2780_v37 = vld [vmem:[#allocation61_spill] sm:$0xff]  ;;  %v2782_v33 = vld [vmem:[#allocation63_spill] sm:$0xff] }
 0x1d1   :  { %v1052_v59 = vadd.f32 %v1051_v9, %v990_v29  ;;  %v2783_v29 = vld [vmem:[#allocation64_spill] sm:$0xff] }
 0x1d2   :  { %v1065_v46 = vadd.f32 %v1064_v61, %v991_v49  ;;  %v1078_v5 = vadd.f32 %v1077_v1, %v992_v53  ;;  %v1091_v23 = vadd.f32 %v1090_v39, %v993_v40  ;;  %v2784_v53 = vld [vmem:[#allocation65_spill] sm:$0xff]  ;;  %v2785_v9 = vld [vmem:[#allocation12_spill] sm:$0xff] }
 0x1d3   :  { %v1053_v10 = vrot.slane %v1052_v59, 4 }
 0x1d4   :  { %v1066_v57 = vrot.slane %v1065_v46, 4  ;;  %v1079_v48 = vrot.slane %v1078_v5, 4  ;;  %v1092_v41 = vrot.slane %v1091_v23, 4 }
 0x1d5   :  { %v1054_v0 = vadd.f32 %v1053_v10, %v1052_v59  ;;  %v2787_v59 = vld [vmem:[#allocation13_spill] sm:$0xff]  ;;  %v2789_v10 = vld [vmem:[#allocation16_spill] sm:$0xff] }
 0x1d6   :  { %v1067_v17 = vadd.f32 %v1066_v57, %v1065_v46  ;;  %v1080_v8 = vadd.f32 %v1079_v48, %v1078_v5  ;;  %v1093_v45 = vadd.f32 %v1092_v41, %v1091_v23  ;;  %v2788_v5 = vld [vmem:[#allocation14_spill] sm:$0xff]  ;;  %v2790_v48 = vld [vmem:[#allocation15_spill] sm:$0xff] }
 0x1d7   :  { %v1055_v15 = vrot.slane %v1054_v0, 2 }
 0x1d8   :  { %v1068_v4 = vrot.slane %v1067_v17, 2  ;;  %v1081_v32 = vrot.slane %v1080_v8, 2  ;;  %v1094_v28 = vrot.slane %v1093_v45, 2 }
 0x1d9   :  { %v1056_v60 = vadd.f32 %v1055_v15, %v1054_v0  ;;  %v2791_v0 = vld [vmem:[#allocation17_spill] sm:$0xff] }
 0x1da   :  { %v1069_v43 = vadd.f32 %v1068_v4, %v1067_v17  ;;  %v1082_v24 = vadd.f32 %v1081_v32, %v1080_v8  ;;  %v1095_v20 = vadd.f32 %v1094_v28, %v1093_v45  ;;  %v2792_v45 = vld [vmem:[#allocation18_spill] sm:$0xff]  ;;  %v2793_v4 = vld [vmem:[#allocation20_spill] sm:$0xff]  ;;  %v2794_v28 = vld [vmem:[#allocation19_spill] sm:$0xff] }
 0x1db   :  { %v1057_v19 = vrot.slane %v1056_v60, 1 }
 0x1dc   :  { %v1070_v3 = vrot.slane %v1069_v43, 1  ;;  %v1083_v13 = vrot.slane %v1082_v24, 1  ;;  %v1096_v27 = vrot.slane %v1095_v20, 1 }
 0x1dd   :  { %v1058_v54 = vadd.f32 %v1057_v19, %v1056_v60 }
 0x1de   :  { %v1071_v58 = vadd.f32 %v1070_v3, %v1069_v43  ;;  %v1084_v16 = vadd.f32 %v1083_v13, %v1082_v24  ;;  %v1097_v50 = vadd.f32 %v1096_v27, %v1095_v20  ;;  %v2795_v43 = vld [vmem:[#allocation21_spill] sm:$0xff]  ;;  %v2796_v20 = vld [vmem:[#allocation23_spill] sm:$0xff]  ;;  %v2799_v27 = vld [vmem:[#allocation26_spill] sm:$0xff] }
 0x1df   :  { %v2797_v3 = vld [vmem:[#allocation25_spill] sm:$0xff] }
 0x1e0   :  { %v1099_v18 = vadd.f32 %v1071_v58, %v1058_v54  ;;  %v2798_v54 = vld [vmem:[#allocation24_spill] sm:$0xff] }
 0x1e2   :  { %v1101_v56 = vadd.f32 %v1099_v18, %v1084_v16 }
 0x1e4   :  { %v1103_v7 = vadd.f32 %v1101_v56, %v1097_v50 }
 0x1e6   :  { %v1105_v14 = vmul.f32 0.00390625, %v1103_v7 }
 0x1e8   :  { %v1107_v25 = vadd.f32 1e-05, %v1105_v14 }
 0x1ea   :  { %1761 = vrsqrt.f32 %v1107_v25 }
 0x1f4   :  { %v1762_v30 = vpop.eup %1761 }
 0x1f5   :  { %v1117_v44 = vrot.slane %v1762_v30, %v2779_v38 }
 0x1f7   :  { %v1180_v34 = vmul.f32 %v1117_v44, %v2777_v6  ;;  %v1181_v2 = vmul.f32 %v1117_v44, %v2778_v51  ;;  %v2500_v62 = vmul.f32 %v1117_v44, %v2780_v37  ;;  %v2503_v31 = vmul.f32 %v1117_v44, %v2781_v21  ;;  %v2786_v51 = vld [vmem:[#allocation11_spill] sm:$0xff] }
 0x1f8   :  { %v2506_v11 = vmul.f32 %v1117_v44, %v2782_v33  ;;  %v2509_v49 = vmul.f32 %v1117_v44, %v2783_v29  ;;  %v2512_v40 = vmul.f32 %v1117_v44, %v2784_v53  ;;  %v1155_v61 = vmul.f32 %v1117_v44, %v2785_v9 }
 0x1f9   :  { %v1244_v6 = vmax.f32 %v1180_v34, 0.0  ;;  %v1245_v1 = vmax.f32 %v1181_v2, 0.0  ;;  %v1156_v39 = vmul.f32 %v1117_v44, %v2786_v51  ;;  %v1157_v46 = vmul.f32 %v1117_v44, %v2787_v59 }
 0x1fa   :  { %v1158_v23 = vmul.f32 %v1117_v44, %v2788_v5  ;;  %v1159_v57 = vmul.f32 %v1117_v44, %v2789_v10  ;;  %v1160_v41 = vmul.f32 %v1117_v44, %v2790_v48  ;;  %v1161_v17 = vmul.f32 %v1117_v44, %v2791_v0 }
 0x1fb   :  { %v1631_v8 = vpack.c.bf16 %v1245_v1, %v1244_v6  ;;  %v1162_v15 = vmul.f32 %v1117_v44, %v2792_v45  ;;  %v1163_v32 = vmul.f32 %v1117_v44, %v2793_v4  ;;  %v1164_v60 = vmul.f32 %v1117_v44, %v2794_v28 }
 0x1fc   :  { %v1165_v24 = vmul.f32 %v1117_v44, %v2795_v43  ;;  %v1166_v19 = vmul.f32 %v1117_v44, %v2796_v20  ;;  %v1167_v13 = vmul.f32 %v1117_v44, %v2797_v3  ;;  %v1168_v58 = vmul.f32 %v1117_v44, %v2798_v54 }
 0x1fd   :  { %1469 = vst [vmem:[#allocation7 + $0xf8] sm:$0xff] %v1631_v8  ;;  %v1169_v16 = vmul.f32 %v1117_v44, %v2799_v27  ;;  %v1170_v18 = vmul.f32 %v1117_v44, %v2313_v35  ;;  %v1171_v50 = vmul.f32 %v1117_v44, %v2316_v52  ;;  %v1172_v56 = vmul.f32 %v1117_v44, %v2319_v26 }
 0x1fe   :  { %v1173_v7 = vmul.f32 %v1117_v44, %v2322_v47  ;;  %v1174_v14 = vmul.f32 %v1117_v44, %v2771_v22  ;;  %v1175_v25 = vmul.f32 %v1117_v44, %v2772_v63  ;;  %v1176_v30 = vmul.f32 %v1117_v44, %v2773_v12 }
 0x1ff   :  { %v1177_v38 = vmul.f32 %v1117_v44, %v2774_v42  ;;  %v1178_v34 = vmul.f32 %v1117_v44, %v2775_v36  ;;  %v1179_v2 = vmul.f32 %v1117_v44, %v2776_v55  ;;  %v1214_v35 = vmax.f32 %v2500_v62, 0.0 }
 0x200   :  { %v1215_v52 = vmax.f32 %v2503_v31, 0.0  ;;  %v1216_v26 = vmax.f32 %v2506_v11, 0.0  ;;  %v1217_v47 = vmax.f32 %v2509_v49, 0.0  ;;  %v1218_v22 = vmax.f32 %v2512_v40, 0.0 }
 0x201   :  { %v1219_v37 = vmax.f32 %v1155_v61, 0.0  ;;  %v1220_v63 = vmax.f32 %v1156_v39, 0.0  ;;  %v1221_v21 = vmax.f32 %v1157_v46, 0.0  ;;  %v1222_v12 = vmax.f32 %v1158_v23, 0.0 }
 0x202   :  { %v1223_v33 = vmax.f32 %v1159_v57, 0.0  ;;  %v1224_v42 = vmax.f32 %v1160_v41, 0.0  ;;  %v1225_v29 = vmax.f32 %v1161_v17, 0.0  ;;  %v1226_v36 = vmax.f32 %v1162_v15, 0.0 }
 0x203   :  { %v1227_v53 = vmax.f32 %v1163_v32, 0.0  ;;  %v1228_v55 = vmax.f32 %v1164_v60, 0.0  ;;  %v1229_v44 = vmax.f32 %v1165_v24, 0.0  ;;  %v1230_v62 = vmax.f32 %v1166_v19, 0.0 }
 0x204   :  { %v1231_v9 = vmax.f32 %v1167_v13, 0.0  ;;  %v1232_v31 = vmax.f32 %v1168_v58, 0.0  ;;  %v1233_v6 = vmax.f32 %v1169_v16, 0.0  ;;  %v1234_v11 = vmax.f32 %v1170_v18, 0.0 }
 0x205   :  { %v1235_v1 = vmax.f32 %v1171_v50, 0.0  ;;  %v1236_v49 = vmax.f32 %v1172_v56, 0.0  ;;  %v1237_v51 = vmax.f32 %v1173_v7, 0.0  ;;  %v1238_v40 = vmax.f32 %v1174_v14, 0.0 }
 0x206   :  { %v1239_v61 = vmax.f32 %v1175_v25, 0.0  ;;  %v1240_v39 = vmax.f32 %v1176_v30, 0.0  ;;  %v1241_v59 = vmax.f32 %v1177_v38, 0.0  ;;  %v1242_v46 = vmax.f32 %v1178_v34, 0.0 }
 0x207   :  { %v1243_v5 = vmax.f32 %v1179_v2, 0.0  ;;  %v1616_v23 = vpack.c.bf16 %v1215_v52, %v1214_v35  ;;  %v1617_v10 = vpack.c.bf16 %v1217_v47, %v1216_v26  ;;  %v1618_v57 = vpack.c.bf16 %v1219_v37, %v1218_v22 }
 0x208   :  { %v1619_v48 = vpack.c.bf16 %v1221_v21, %v1220_v63  ;;  %v1620_v41 = vpack.c.bf16 %v1223_v33, %v1222_v12  ;;  %v1621_v0 = vpack.c.bf16 %v1225_v29, %v1224_v42  ;;  %v1622_v17 = vpack.c.bf16 %v1227_v53, %v1226_v36 }
 0x209   :  { %v1623_v8 = vpack.c.bf16 %v1229_v44, %v1228_v55  ;;  %v1624_v45 = vpack.c.bf16 %v1231_v9, %v1230_v62  ;;  %v1625_v15 = vpack.c.bf16 %v1233_v6, %v1232_v31  ;;  %v1626_v4 = vpack.c.bf16 %v1235_v1, %v1234_v11  ;;  %1454 = vst [vmem:[#allocation7 + $0x80] sm:$0xff] %v1616_v23 }
 0x20a   :  { %1455 = vst [vmem:[#allocation7 + $0x88] sm:$0xff] %v1617_v10  ;;  %1456 = vst [vmem:[#allocation7 + $0x90] sm:$0xff] %v1618_v57  ;;  %v1627_v32 = vpack.c.bf16 %v1237_v51, %v1236_v49  ;;  %v1628_v28 = vpack.c.bf16 %v1239_v61, %v1238_v40  ;;  %v1629_v60 = vpack.c.bf16 %v1241_v59, %v1240_v39 }
 0x20b   :  { %v1630_v43 = vpack.c.bf16 %v1243_v5, %v1242_v46  ;;  %1457 = vst [vmem:[#allocation7 + $0x98] sm:$0xff] %v1619_v48  ;;  %1458 = vst [vmem:[#allocation7 + $0xa0] sm:$0xff] %v1620_v41 }
 0x20c   :  { %1459 = vst [vmem:[#allocation7 + $0xa8] sm:$0xff] %v1621_v0  ;;  %1460 = vst [vmem:[#allocation7 + $0xb0] sm:$0xff] %v1622_v17 }
 0x20d   :  { %1461 = vst [vmem:[#allocation7 + $0xb8] sm:$0xff] %v1623_v8  ;;  %1462 = vst [vmem:[#allocation7 + $0xc0] sm:$0xff] %v1624_v45 }
 0x20e   :  { %1463 = vst [vmem:[#allocation7 + $0xc8] sm:$0xff] %v1625_v15  ;;  %1464 = vst [vmem:[#allocation7 + $0xd0] sm:$0xff] %v1626_v4 }
 0x20f   :  { %1465 = vst [vmem:[#allocation7 + $0xd8] sm:$0xff] %v1627_v32  ;;  %1466 = vst [vmem:[#allocation7 + $0xe0] sm:$0xff] %v1628_v28 }
 0x210   :  { %1467 = vst [vmem:[#allocation7 + $0xe8] sm:$0xff] %v1629_v60  ;;  %1468 = vst [vmem:[#allocation7 + $0xf0] sm:$0xff] %v1630_v43 }
 0x211   :  { %1818 = shalt.err (!%p1815_p6)
}
 0x212   :  { %s1819_s12 = scalar_lea.hbm %s2561_s2, 4096 }
 0x213   :  { %p1820_p7 = scmp.ne.s32.totalorder %s2561_s2, %s1819_s12  ;;  %p1823_p8 = scmp.lt.u32.totalorder %s1819_s12, %s2561_s2 }
 0x215   :  { %p1825_p9 = pnand %p1823_p8, %p1820_p7 }
 0x217   :  { %1828 = shalt.err (!%p1825_p9)
}
 0x218   :  { %1481 = dma.vmem_to_hbm [thread:$0]  %s1476_s8, 4096, %s2561_s2, [#allocation4], %s1839_s0, %s1839_s0, %s1840_s5  }
 0x219   :  { %1833 = dma.done.wait [#allocation4], 4096  }
 0x21a   :  { %1834 = vsyncadd [#allocation4], 4294963200 }
 0x21b   :  { %1485 = vsyncpa [#allocation3], 1 }
 0x21c   :  { %1486 = vsyncpa [#allocation6], 1 }
 0x21d   :  { %1487 = vsyncpa [#allocation4], 1 }

</bundles_post_ra>
